<compile_context>
chip_gen: v5e
topology: v5e:2x2
jax: 0.10.0
libtpu: 0.0.40
codegen_flags: <defaults>
</compile_context>

<pallas_src>
import functools

import jax
import jax.numpy as jnp
from jax import lax
from jax.experimental import pallas as pl
from jax.experimental.pallas import tpu as pltpu


def _smooth_joint_kernel(pose_ref, out_ref, vacc_ref, carry_ref, *,
                         degree, loss_func, scale):
    i = pl.program_id(0)
    nt = pl.num_programs(0)
    jp = pose_ref.shape[1]
    tf = pose_ref.shape[2]

    @pl.when(i == 0)
    def _init():
        vacc_ref[...] = jnp.zeros_like(vacc_ref)
        carry_ref[...] = jnp.zeros_like(carry_ref)

    x = pose_ref[0]          # (jp, tf)  joints on sublanes, frames on lanes
    y = pose_ref[1]
    z = pose_ref[2]
    if degree:
        k = jnp.float32(jnp.pi / 180.0)
        x, y, z = x * k, y * k, z * k

    # axis-angle -> rotation matrix (Rodrigues); keep first two rows = rot6d.
    # EUP ops: rsqrt, sin, cos (no sqrt / divides).
    theta_sq = x * x + y * y + z * z
    small = theta_sq < 1e-8                       # theta < 1e-4
    inv_t = lax.rsqrt(jnp.where(small, 1.0, theta_sq))
    theta = theta_sq * inv_t
    s = jnp.sin(theta)
    c_raw = jnp.cos(theta)
    A = jnp.where(small, 1.0 - theta_sq * (1.0 / 6.0), s * inv_t)        # sin(t)/t
    B = jnp.where(small, 0.5 - theta_sq * (1.0 / 24.0),
                  (1.0 - c_raw) * (inv_t * inv_t))                       # (1-cos t)/t^2
    c = jnp.where(small, 1.0 - 0.5 * theta_sq, c_raw)

    Bx = B * x
    By = B * y
    comps = (
        lambda: c + Bx * x,        # r00
        lambda: Bx * y - A * z,    # r01
        lambda: Bx * z + A * y,    # r02
        lambda: Bx * y + A * z,    # r10
        lambda: c + By * y,        # r11
        lambda: By * z - A * x,    # r12
    )

    lane = lax.broadcasted_iota(jnp.int32, (jp, tf), 1)
    lane_is0 = lane == 0

    acc = jnp.zeros((jp, tf), jnp.float32)
    # Interleave: compute each rot6d row, diff it and fold into acc before the
    # next one, keeping the number of live (jp, tf) temporaries small.
    for kk, make_r in enumerate(comps):
        r = make_r()
        rolled = pltpu.roll(r, shift=1, axis=1)       # rolled[:, f] = r[:, f-1]
        prev_edge = carry_ref[kk]                     # (jp, 1): last frame of prev tile
        carry_ref[kk] = rolled[:, 0:1]                # = r[:, tf-1], carry for next tile
        prev = jnp.where(lane_is0, prev_edge, rolled)
        d = r - prev
        acc = acc + (jnp.abs(d) if loss_func == 'L1' else d * d)

    # Mask the prepended-zero entry (global frame 0) once, after the loop.
    gidx = lane + i * tf
    acc = jnp.where(gidx > 0, acc, 0.0)
    vacc_ref[...] = vacc_ref[...] + acc

    @pl.when(i == nt - 1)
    def _finish():
        total = jnp.sum(vacc_ref[...], axis=(0, 1), keepdims=True)   # (1, 1)
        out_ref[...] = total * jnp.float32(scale)


def smooth_joint_loss(body_pose, *, reduction='mean', loss_weight=1.0,
                      degree=False, loss_func='L1', max_frames_per_tile=1024):
    # TODO(synk): reduction='none' needs a per-frame vector output path.
    assert reduction in ('mean', 'sum')
    assert loss_func in ('L1', 'L2')
    n_frames = body_pose.shape[0]
    theta = body_pose.reshape(n_frames, -1, 3).astype(jnp.float32)   # (F, J, 3)
    n_joints = theta.shape[1]

    # joints -> sublanes (pad to multiple of 8 with zeros = identity rotation)
    jp = 8 * (-(-n_joints // 8))
    # frames -> lanes (tile of TF = chunks*128 lanes; pad with edge replication
    # so padded frames produce exactly zero frame-to-frame diff)
    f128 = -(-n_frames // 128)
    chunks = max(1, min(max_frames_per_tile // 128, f128))
    tf = 128 * chunks
    nt = -(-f128 // chunks)
    fp = nt * tf

    planes = jnp.transpose(theta, (2, 1, 0))                          # (3, J, F)
    planes = jnp.pad(planes, ((0, 0), (0, jp - n_joints), (0, 0)))
    planes = jnp.pad(planes, ((0, 0), (0, 0), (0, fp - n_frames)), mode='edge')

    scale = loss_weight / n_frames if reduction == 'mean' else loss_weight
    kernel = functools.partial(_smooth_joint_kernel, degree=degree,
                               loss_func=loss_func, scale=scale)

    out = pl.pallas_call(
        kernel,
        out_shape=jax.ShapeDtypeStruct((1, 1), jnp.float32),
        grid=(nt,),
        in_specs=[pl.BlockSpec((3, jp, tf), lambda i: (0, 0, i))],
        out_specs=pl.BlockSpec((1, 1), lambda i: (0, 0)),
        scratch_shapes=[
            pltpu.VMEM((jp, tf), jnp.float32),    # cross-tile vector accumulator
            pltpu.VMEM((6, jp, 1), jnp.float32),  # carried last-frame rot6d rows
        ],
        compiler_params=pltpu.CompilerParams(
            dimension_semantics=("arbitrary",),   # sequential: carry across tiles
            vmem_limit_bytes=32 * 1024 * 1024,    # safe on v5e/v6e/v7x; usage ~1 MiB
        ),
        cost_estimate=pl.CostEstimate(
            flops=int(60 * jp * fp),
            transcendentals=int(3 * jp * fp),
            bytes_accessed=int(3 * jp * fp * 4 + 4),
        ),
    )(planes)
    return out[0, 0]


# ---- pure-JAX reference (quaternion path, matches pytorch3d semantics) ----
def _aa_to_rot6d_ref(theta):
    angle = jnp.sqrt(jnp.sum(theta * theta, axis=-1, keepdims=True))
    half = 0.5 * angle
    small = angle < 1e-4
    shoa = jnp.where(small, 0.5 - angle * angle / 48.0,
                     jnp.sin(half) / jnp.where(small, 1.0, angle))
    qw = jnp.cos(half)[..., 0]
    qx, qy, qz = (theta * shoa)[..., 0], (theta * shoa)[..., 1], (theta * shoa)[..., 2]
    r00 = 1.0 - 2.0 * (qy * qy + qz * qz)
    r01 = 2.0 * (qx * qy - qz * qw)
    r02 = 2.0 * (qx * qz + qy * qw)
    r10 = 2.0 * (qx * qy + qz * qw)
    r11 = 1.0 - 2.0 * (qx * qx + qz * qz)
    r12 = 2.0 * (qy * qz - qx * qw)
    return jnp.stack([r00, r01, r02, r10, r11, r12], axis=-1)


def _reference(body_pose, reduction='mean', loss_weight=1.0, degree=False, loss_func='L1'):
    theta = body_pose.reshape(body_pose.shape[0], -1, 3).astype(jnp.float32)
    if degree:
        theta = theta * jnp.pi / 180.0
    rot6d = _aa_to_rot6d_ref(theta)
    diff = rot6d[1:] - rot6d[:-1]
    per = jnp.sum(jnp.abs(diff), axis=(1, 2)) if loss_func == 'L1' \
        else jnp.sum(diff * diff, axis=(1, 2))
    per = jnp.concatenate([jnp.zeros((1,), per.dtype), per])
    loss = per.mean() if reduction == 'mean' else per.sum()
    return loss * loss_weight


if __name__ == "__main__":
    key = jax.random.PRNGKey(0)
    k1, k2 = jax.random.split(key)

    n_joints = 21
    # single-tile case
    bp_small = 0.5 * jax.random.normal(k1, (8, n_joints * 3), dtype=jnp.float32)
    # multi-tile case: 300 frames, 128-frame tiles -> 3 grid steps
    # (exercises the cross-tile carry and the edge-padded frames)
    bp_multi = 0.5 * jax.random.normal(k2, (300, n_joints * 3), dtype=jnp.float32)
    bp_deg = 60.0 * bp_multi   # degree-valued input for the degree=True path

    cases = [
        (bp_small, dict(reduction='mean', loss_func='L1', degree=False, loss_weight=1.0), {}),
        (bp_small, dict(reduction='sum', loss_func='L2', degree=False, loss_weight=1.0), {}),
        (bp_multi, dict(reduction='mean', loss_func='L1', degree=False, loss_weight=1.0),
         dict(max_frames_per_tile=128)),
        (bp_deg, dict(reduction='sum', loss_func='L2', degree=True, loss_weight=2.0),
         dict(max_frames_per_tile=128)),
    ]

    ok = True
    for bp, cfg, extra in cases:
        got = jax.block_until_ready(smooth_joint_loss(bp, **cfg, **extra))
        want = _reference(bp, **cfg)
        if not jnp.allclose(got, want, rtol=1e-4, atol=1e-4):
            ok = False
            print(f"MISMATCH {cfg} {extra}: kernel={got} ref={want}")

    if ok:
        print("KERNEL_OK")
</pallas_src>

<mosaic_0001>
module attributes {stable_mosaic.version = 11 : i64} {
  func.func @_smooth_joint_kernel(%arg0: i32, %arg1: memref<3x24x128xf32, #tpu.memory_space<vmem>>, %arg2: memref<1x1xf32, #tpu.memory_space<vmem>>, %arg3: memref<24x128xf32, #tpu.memory_space<vmem>>, %arg4: memref<6x24x1xf32, #tpu.memory_space<vmem>>) attributes {dimension_semantics = [#tpu.dimension_semantics<arbitrary>], iteration_bounds = array<i64: 1>, scalar_prefetch = 0 : i64, scratch_operands = 2 : i64, tpu.core_type = #tpu.core_type<tc>, window_params = [{transform_indices = @transform_0, window_bounds = array<i64: 3, 24, 128>}, {pipeline_mode = #tpu.pipeline_mode<synchronous>, transform_indices = @transform_1, window_bounds = array<i64: 1, 1>}]} {
    %c0_i32 = arith.constant 0 : i32
    %0 = arith.cmpi eq, %arg0, %c0_i32 : i32
    %1 = arith.extui %0 : i1 to i32
    %c0_i32_0 = arith.constant 0 : i32
    %2 = arith.cmpi ne, %1, %c0_i32_0 : i32
    scf.if %2 {
      %cst_63 = arith.constant 0.000000e+00 : f32
      %155 = vector.broadcast %cst_63 : f32 to vector<24x128xf32>
      %c0_64 = arith.constant 0 : index
      %c0_65 = arith.constant 0 : index
      %156 = vector.load %arg3[%c0_64, %c0_65] : memref<24x128xf32, #tpu.memory_space<vmem>>, vector<24x128xf32>
      tpu.vector_store %arg3[%c0_64, %c0_65], %155 {strides = array<i32>} : memref<24x128xf32, #tpu.memory_space<vmem>>, vector<24x128xf32>,
      %cst_66 = arith.constant 0.000000e+00 : f32
      %157 = vector.broadcast %cst_66 : f32 to vector<6x24x1xf32>
      %c0_67 = arith.constant 0 : index
      %c0_68 = arith.constant 0 : index
      %c0_69 = arith.constant 0 : index
      %158 = vector.load %arg4[%c0_67, %c0_68, %c0_69] : memref<6x24x1xf32, #tpu.memory_space<vmem>>, vector<6x24x1xf32>
      tpu.vector_store %arg4[%c0_67, %c0_68, %c0_69], %157 {strides = array<i32>} : memref<6x24x1xf32, #tpu.memory_space<vmem>>, vector<6x24x1xf32>,
    } else {
    }
    %c0 = arith.constant 0 : index
    %c0_1 = arith.constant 0 : index
    %c0_2 = arith.constant 0 : index
    %3 = vector.load %arg1[%c0, %c0_1, %c0_2] : memref<3x24x128xf32, #tpu.memory_space<vmem>>, vector<1x24x128xf32>
    %4 = vector.shape_cast %3 : vector<1x24x128xf32> to vector<24x128xf32>
    %c1 = arith.constant 1 : index
    %c0_3 = arith.constant 0 : index
    %c0_4 = arith.constant 0 : index
    %5 = vector.load %arg1[%c1, %c0_3, %c0_4] : memref<3x24x128xf32, #tpu.memory_space<vmem>>, vector<1x24x128xf32>
    %6 = vector.shape_cast %5 : vector<1x24x128xf32> to vector<24x128xf32>
    %c2 = arith.constant 2 : index
    %c0_5 = arith.constant 0 : index
    %c0_6 = arith.constant 0 : index
    %7 = vector.load %arg1[%c2, %c0_5, %c0_6] : memref<3x24x128xf32, #tpu.memory_space<vmem>>, vector<1x24x128xf32>
    %8 = vector.shape_cast %7 : vector<1x24x128xf32> to vector<24x128xf32>
    %9 = arith.mulf %4, %4 : vector<24x128xf32>
    %10 = arith.mulf %6, %6 : vector<24x128xf32>
    %11 = arith.addf %9, %10 : vector<24x128xf32>
    %12 = arith.mulf %8, %8 : vector<24x128xf32>
    %13 = arith.addf %11, %12 : vector<24x128xf32>
    %cst = arith.constant 9.99999993E-9 : f32
    %14 = vector.broadcast %cst : f32 to vector<24x128xf32>
    %15 = arith.cmpf olt, %13, %14 : vector<24x128xf32>
    %cst_7 = arith.constant 1.000000e+00 : f32
    %16 = vector.broadcast %cst_7 : f32 to vector<24x128xf32>
    %17 = arith.select %15, %16, %13 : vector<24x128xi1>, vector<24x128xf32>
    %18 = math.rsqrt %17 : vector<24x128xf32>
    %19 = arith.mulf %13, %18 : vector<24x128xf32>
    %20 = math.sin %19 : vector<24x128xf32>
    %21 = math.cos %19 : vector<24x128xf32>
    %cst_8 = arith.constant 0.166666672 : f32
    %22 = vector.broadcast %cst_8 : f32 to vector<24x128xf32>
    %23 = arith.mulf %13, %22 : vector<24x128xf32>
    %cst_9 = arith.constant 1.000000e+00 : f32
    %24 = vector.broadcast %cst_9 : f32 to vector<24x128xf32>
    %25 = arith.subf %24, %23 : vector<24x128xf32>
    %26 = arith.mulf %20, %18 : vector<24x128xf32>
    %27 = arith.select %15, %25, %26 : vector<24x128xi1>, vector<24x128xf32>
    %cst_10 = arith.constant 0.0416666679 : f32
    %28 = vector.broadcast %cst_10 : f32 to vector<24x128xf32>
    %29 = arith.mulf %13, %28 : vector<24x128xf32>
    %cst_11 = arith.constant 5.000000e-01 : f32
    %30 = vector.broadcast %cst_11 : f32 to vector<24x128xf32>
    %31 = arith.subf %30, %29 : vector<24x128xf32>
    %cst_12 = arith.constant 1.000000e+00 : f32
    %32 = vector.broadcast %cst_12 : f32 to vector<24x128xf32>
    %33 = arith.subf %32, %21 : vector<24x128xf32>
    %34 = arith.mulf %18, %18 : vector<24x128xf32>
    %35 = arith.mulf %33, %34 : vector<24x128xf32>
    %36 = arith.select %15, %31, %35 : vector<24x128xi1>, vector<24x128xf32>
    %cst_13 = arith.constant 5.000000e-01 : f32
    %37 = vector.broadcast %cst_13 : f32 to vector<24x128xf32>
    %38 = arith.mulf %37, %13 : vector<24x128xf32>
    %cst_14 = arith.constant 1.000000e+00 : f32
    %39 = vector.broadcast %cst_14 : f32 to vector<24x128xf32>
    %40 = arith.subf %39, %38 : vector<24x128xf32>
    %41 = arith.select %15, %40, %21 : vector<24x128xi1>, vector<24x128xf32>
    %42 = arith.mulf %36, %4 : vector<24x128xf32>
    %43 = arith.mulf %36, %6 : vector<24x128xf32>
    %44 = tpu.iota {dimensions = array<i32: 1>} : vector<24x128xi32>
    %c0_i32_15 = arith.constant 0 : i32
    %45 = vector.broadcast %c0_i32_15 : i32 to vector<24x128xi32>
    %46 = arith.cmpi eq, %44, %45 : vector<24x128xi32>
    %cst_16 = arith.constant 0.000000e+00 : f32
    %47 = vector.broadcast %cst_16 : f32 to vector<24x128xf32>
    %48 = arith.mulf %42, %4 : vector<24x128xf32>
    %49 = arith.addf %41, %48 : vector<24x128xf32>
    %c1_i32 = arith.constant 1 : i32
    %50 = tpu.dynamic_rotate %49 by %c1_i32 dim 1 : vector<24x128xf32>, i32 -> vector<24x128xf32>
    %c0_17 = arith.constant 0 : index
    %c0_18 = arith.constant 0 : index
    %c0_19 = arith.constant 0 : index
    %51 = vector.load %arg4[%c0_17, %c0_18, %c0_19] : memref<6x24x1xf32, #tpu.memory_space<vmem>>, vector<1x24x1xf32>
    %52 = vector.shape_cast %51 : vector<1x24x1xf32> to vector<24x1xf32>
    %53 = vector.extract_strided_slice %50 {offsets = [0, 0], sizes = [24, 1], strides = [1, 1]} : vector<24x128xf32> to vector<24x1xf32>
    %c0_20 = arith.constant 0 : index
    %c0_21 = arith.constant 0 : index
    %c0_22 = arith.constant 0 : index
    %54 = vector.load %arg4[%c0_20, %c0_21, %c0_22] : memref<6x24x1xf32, #tpu.memory_space<vmem>>, vector<1x24x1xf32>
    %55 = vector.shape_cast %54 : vector<1x24x1xf32> to vector<24x1xf32>
    %56 = vector.shape_cast %53 : vector<24x1xf32> to vector<1x24x1xf32>
    tpu.vector_store %arg4[%c0_20, %c0_21, %c0_22], %56 {strides = array<i32>} : memref<6x24x1xf32, #tpu.memory_space<vmem>>, vector<1x24x1xf32>,
    %57 = vector.shape_cast %52 : vector<24x1xf32> to vector<24x1xf32>
    %58 = vector.broadcast %57 : vector<24x1xf32> to vector<24x128xf32>
    %59 = arith.select %46, %58, %50 : vector<24x128xi1>, vector<24x128xf32>
    %60 = arith.subf %49, %59 : vector<24x128xf32>
    %61 = math.absf %60 : vector<24x128xf32>
    %62 = arith.addf %47, %61 : vector<24x128xf32>
    %63 = arith.mulf %42, %6 : vector<24x128xf32>
    %64 = arith.mulf %27, %8 : vector<24x128xf32>
    %65 = arith.subf %63, %64 : vector<24x128xf32>
    %c1_i32_23 = arith.constant 1 : i32
    %66 = tpu.dynamic_rotate %65 by %c1_i32_23 dim 1 : vector<24x128xf32>, i32 -> vector<24x128xf32>
    %c1_24 = arith.constant 1 : index
    %c0_25 = arith.constant 0 : index
    %c0_26 = arith.constant 0 : index
    %67 = vector.load %arg4[%c1_24, %c0_25, %c0_26] : memref<6x24x1xf32, #tpu.memory_space<vmem>>, vector<1x24x1xf32>
    %68 = vector.shape_cast %67 : vector<1x24x1xf32> to vector<24x1xf32>
    %69 = vector.extract_strided_slice %66 {offsets = [0, 0], sizes = [24, 1], strides = [1, 1]} : vector<24x128xf32> to vector<24x1xf32>
    %c1_27 = arith.constant 1 : index
    %c0_28 = arith.constant 0 : index
    %c0_29 = arith.constant 0 : index
    %70 = vector.load %arg4[%c1_27, %c0_28, %c0_29] : memref<6x24x1xf32, #tpu.memory_space<vmem>>, vector<1x24x1xf32>
    %71 = vector.shape_cast %70 : vector<1x24x1xf32> to vector<24x1xf32>
    %72 = vector.shape_cast %69 : vector<24x1xf32> to vector<1x24x1xf32>
    tpu.vector_store %arg4[%c1_27, %c0_28, %c0_29], %72 {strides = array<i32>} : memref<6x24x1xf32, #tpu.memory_space<vmem>>, vector<1x24x1xf32>,
    %73 = vector.shape_cast %68 : vector<24x1xf32> to vector<24x1xf32>
    %74 = vector.broadcast %73 : vector<24x1xf32> to vector<24x128xf32>
    %75 = arith.select %46, %74, %66 : vector<24x128xi1>, vector<24x128xf32>
    %76 = arith.subf %65, %75 : vector<24x128xf32>
    %77 = math.absf %76 : vector<24x128xf32>
    %78 = arith.addf %62, %77 : vector<24x128xf32>
    %79 = arith.mulf %42, %8 : vector<24x128xf32>
    %80 = arith.mulf %27, %6 : vector<24x128xf32>
    %81 = arith.addf %79, %80 : vector<24x128xf32>
    %c1_i32_30 = arith.constant 1 : i32
    %82 = tpu.dynamic_rotate %81 by %c1_i32_30 dim 1 : vector<24x128xf32>, i32 -> vector<24x128xf32>
    %c2_31 = arith.constant 2 : index
    %c0_32 = arith.constant 0 : index
    %c0_33 = arith.constant 0 : index
    %83 = vector.load %arg4[%c2_31, %c0_32, %c0_33] : memref<6x24x1xf32, #tpu.memory_space<vmem>>, vector<1x24x1xf32>
    %84 = vector.shape_cast %83 : vector<1x24x1xf32> to vector<24x1xf32>
    %85 = vector.extract_strided_slice %82 {offsets = [0, 0], sizes = [24, 1], strides = [1, 1]} : vector<24x128xf32> to vector<24x1xf32>
    %c2_34 = arith.constant 2 : index
    %c0_35 = arith.constant 0 : index
    %c0_36 = arith.constant 0 : index
    %86 = vector.load %arg4[%c2_34, %c0_35, %c0_36] : memref<6x24x1xf32, #tpu.memory_space<vmem>>, vector<1x24x1xf32>
    %87 = vector.shape_cast %86 : vector<1x24x1xf32> to vector<24x1xf32>
    %88 = vector.shape_cast %85 : vector<24x1xf32> to vector<1x24x1xf32>
    tpu.vector_store %arg4[%c2_34, %c0_35, %c0_36], %88 {strides = array<i32>} : memref<6x24x1xf32, #tpu.memory_space<vmem>>, vector<1x24x1xf32>,
    %89 = vector.shape_cast %84 : vector<24x1xf32> to vector<24x1xf32>
    %90 = vector.broadcast %89 : vector<24x1xf32> to vector<24x128xf32>
    %91 = arith.select %46, %90, %82 : vector<24x128xi1>, vector<24x128xf32>
    %92 = arith.subf %81, %91 : vector<24x128xf32>
    %93 = math.absf %92 : vector<24x128xf32>
    %94 = arith.addf %78, %93 : vector<24x128xf32>
    %95 = arith.mulf %42, %6 : vector<24x128xf32>
    %96 = arith.mulf %27, %8 : vector<24x128xf32>
    %97 = arith.addf %95, %96 : vector<24x128xf32>
    %c1_i32_37 = arith.constant 1 : i32
    %98 = tpu.dynamic_rotate %97 by %c1_i32_37 dim 1 : vector<24x128xf32>, i32 -> vector<24x128xf32>
    %c3 = arith.constant 3 : index
    %c0_38 = arith.constant 0 : index
    %c0_39 = arith.constant 0 : index
    %99 = vector.load %arg4[%c3, %c0_38, %c0_39] : memref<6x24x1xf32, #tpu.memory_space<vmem>>, vector<1x24x1xf32>
    %100 = vector.shape_cast %99 : vector<1x24x1xf32> to vector<24x1xf32>
    %101 = vector.extract_strided_slice %98 {offsets = [0, 0], sizes = [24, 1], strides = [1, 1]} : vector<24x128xf32> to vector<24x1xf32>
    %c3_40 = arith.constant 3 : index
    %c0_41 = arith.constant 0 : index
    %c0_42 = arith.constant 0 : index
    %102 = vector.load %arg4[%c3_40, %c0_41, %c0_42] : memref<6x24x1xf32, #tpu.memory_space<vmem>>, vector<1x24x1xf32>
    %103 = vector.shape_cast %102 : vector<1x24x1xf32> to vector<24x1xf32>
    %104 = vector.shape_cast %101 : vector<24x1xf32> to vector<1x24x1xf32>
    tpu.vector_store %arg4[%c3_40, %c0_41, %c0_42], %104 {strides = array<i32>} : memref<6x24x1xf32, #tpu.memory_space<vmem>>, vector<1x24x1xf32>,
    %105 = vector.shape_cast %100 : vector<24x1xf32> to vector<24x1xf32>
    %106 = vector.broadcast %105 : vector<24x1xf32> to vector<24x128xf32>
    %107 = arith.select %46, %106, %98 : vector<24x128xi1>, vector<24x128xf32>
    %108 = arith.subf %97, %107 : vector<24x128xf32>
    %109 = math.absf %108 : vector<24x128xf32>
    %110 = arith.addf %94, %109 : vector<24x128xf32>
    %111 = arith.mulf %43, %6 : vector<24x128xf32>
    %112 = arith.addf %41, %111 : vector<24x128xf32>
    %c1_i32_43 = arith.constant 1 : i32
    %113 = tpu.dynamic_rotate %112 by %c1_i32_43 dim 1 : vector<24x128xf32>, i32 -> vector<24x128xf32>
    %c4 = arith.constant 4 : index
    %c0_44 = arith.constant 0 : index
    %c0_45 = arith.constant 0 : index
    %114 = vector.load %arg4[%c4, %c0_44, %c0_45] : memref<6x24x1xf32, #tpu.memory_space<vmem>>, vector<1x24x1xf32>
    %115 = vector.shape_cast %114 : vector<1x24x1xf32> to vector<24x1xf32>
    %116 = vector.extract_strided_slice %113 {offsets = [0, 0], sizes = [24, 1], strides = [1, 1]} : vector<24x128xf32> to vector<24x1xf32>
    %c4_46 = arith.constant 4 : index
    %c0_47 = arith.constant 0 : index
    %c0_48 = arith.constant 0 : index
    %117 = vector.load %arg4[%c4_46, %c0_47, %c0_48] : memref<6x24x1xf32, #tpu.memory_space<vmem>>, vector<1x24x1xf32>
    %118 = vector.shape_cast %117 : vector<1x24x1xf32> to vector<24x1xf32>
    %119 = vector.shape_cast %116 : vector<24x1xf32> to vector<1x24x1xf32>
    tpu.vector_store %arg4[%c4_46, %c0_47, %c0_48], %119 {strides = array<i32>} : memref<6x24x1xf32, #tpu.memory_space<vmem>>, vector<1x24x1xf32>,
    %120 = vector.shape_cast %115 : vector<24x1xf32> to vector<24x1xf32>
    %121 = vector.broadcast %120 : vector<24x1xf32> to vector<24x128xf32>
    %122 = arith.select %46, %121, %113 : vector<24x128xi1>, vector<24x128xf32>
    %123 = arith.subf %112, %122 : vector<24x128xf32>
    %124 = math.absf %123 : vector<24x128xf32>
    %125 = arith.addf %110, %124 : vector<24x128xf32>
    %126 = arith.mulf %43, %8 : vector<24x128xf32>
    %127 = arith.mulf %27, %4 : vector<24x128xf32>
    %128 = arith.subf %126, %127 : vector<24x128xf32>
    %c1_i32_49 = arith.constant 1 : i32
    %129 = tpu.dynamic_rotate %128 by %c1_i32_49 dim 1 : vector<24x128xf32>, i32 -> vector<24x128xf32>
    %c5 = arith.constant 5 : index
    %c0_50 = arith.constant 0 : index
    %c0_51 = arith.constant 0 : index
    %130 = vector.load %arg4[%c5, %c0_50, %c0_51] : memref<6x24x1xf32, #tpu.memory_space<vmem>>, vector<1x24x1xf32>
    %131 = vector.shape_cast %130 : vector<1x24x1xf32> to vector<24x1xf32>
    %132 = vector.extract_strided_slice %129 {offsets = [0, 0], sizes = [24, 1], strides = [1, 1]} : vector<24x128xf32> to vector<24x1xf32>
    %c5_52 = arith.constant 5 : index
    %c0_53 = arith.constant 0 : index
    %c0_54 = arith.constant 0 : index
    %133 = vector.load %arg4[%c5_52, %c0_53, %c0_54] : memref<6x24x1xf32, #tpu.memory_space<vmem>>, vector<1x24x1xf32>
    %134 = vector.shape_cast %133 : vector<1x24x1xf32> to vector<24x1xf32>
    %135 = vector.shape_cast %132 : vector<24x1xf32> to vector<1x24x1xf32>
    tpu.vector_store %arg4[%c5_52, %c0_53, %c0_54], %135 {strides = array<i32>} : memref<6x24x1xf32, #tpu.memory_space<vmem>>, vector<1x24x1xf32>,
    %136 = vector.shape_cast %131 : vector<24x1xf32> to vector<24x1xf32>
    %137 = vector.broadcast %136 : vector<24x1xf32> to vector<24x128xf32>
    %138 = arith.select %46, %137, %129 : vector<24x128xi1>, vector<24x128xf32>
    %139 = arith.subf %128, %138 : vector<24x128xf32>
    %140 = math.absf %139 : vector<24x128xf32>
    %141 = arith.addf %125, %140 : vector<24x128xf32>
    %c128_i32 = arith.constant 128 : i32
    %142 = arith.muli %arg0, %c128_i32 : i32
    %143 = vector.broadcast %142 : i32 to vector<24x128xi32>
    %144 = arith.addi %44, %143 : vector<24x128xi32>
    %c0_i32_55 = arith.constant 0 : i32
    %145 = vector.broadcast %c0_i32_55 : i32 to vector<24x128xi32>
    %146 = arith.cmpi sgt, %144, %145 : vector<24x128xi32>
    %cst_56 = arith.constant 0.000000e+00 : f32
    %147 = vector.broadcast %cst_56 : f32 to vector<24x128xf32>
    %148 = arith.select %146, %141, %147 : vector<24x128xi1>, vector<24x128xf32>
    %c0_57 = arith.constant 0 : index
    %c0_58 = arith.constant 0 : index
    %149 = vector.load %arg3[%c0_57, %c0_58] : memref<24x128xf32, #tpu.memory_space<vmem>>, vector<24x128xf32>
    %150 = arith.addf %149, %148 : vector<24x128xf32>
    %c0_59 = arith.constant 0 : index
    %c0_60 = arith.constant 0 : index
    %151 = vector.load %arg3[%c0_59, %c0_60] : memref<24x128xf32, #tpu.memory_space<vmem>>, vector<24x128xf32>
    tpu.vector_store %arg3[%c0_59, %c0_60], %150 {strides = array<i32>} : memref<24x128xf32, #tpu.memory_space<vmem>>, vector<24x128xf32>,
    %c0_i32_61 = arith.constant 0 : i32
    %152 = arith.cmpi eq, %arg0, %c0_i32_61 : i32
    %153 = arith.extui %152 : i1 to i32
    %c0_i32_62 = arith.constant 0 : i32
    %154 = arith.cmpi ne, %153, %c0_i32_62 : i32
    scf.if %154 {
      %c0_63 = arith.constant 0 : index
      %c0_64 = arith.constant 0 : index
      %155 = vector.load %arg3[%c0_63, %c0_64] : memref<24x128xf32, #tpu.memory_space<vmem>>, vector<24x128xf32>
      %156 = vector.shape_cast %155 : vector<24x128xf32> to vector<1x24x128xf32>
      %cst_65 = arith.constant dense<0.000000e+00> : vector<1xf32>
      %157 = vector.multi_reduction <add>, %156, %cst_65 [1, 2] : vector<1x24x128xf32> to vector<1xf32>
      %158 = vector.shape_cast %157 : vector<1xf32> to vector<1x1x1xf32>
      %159 = vector.extract %158[0, 0, 0] : f32 from vector<1x1x1xf32>
      %160 = vector.broadcast %159 : f32 to vector<1x1xf32>
      %cst_66 = arith.constant 1.250000e-01 : f32
      %161 = vector.broadcast %cst_66 : f32 to vector<1x1xf32>
      %162 = arith.mulf %160, %161 : vector<1x1xf32>
      %c0_67 = arith.constant 0 : index
      %c0_68 = arith.constant 0 : index
      %163 = vector.load %arg2[%c0_67, %c0_68] : memref<1x1xf32, #tpu.memory_space<vmem>>, vector<1x1xf32>
      tpu.vector_store %arg2[%c0_67, %c0_68], %162 {strides = array<i32>} : memref<1x1xf32, #tpu.memory_space<vmem>>, vector<1x1xf32>,
    } else {
    }
    return
  }
  func.func @transform_0(%arg0: i32) -> (i32, i32, i32) {
    %c0_i32 = arith.constant 0 : i32
    %c0_i32_0 = arith.constant 0 : i32
    %c0_i32_1 = arith.constant 0 : i32
    return %c0_i32, %c0_i32_0, %arg0 : i32, i32, i32
  }
  func.func @transform_1(%arg0: i32) -> (i32, i32) {
    %c0_i32 = arith.constant 0 : i32
    %c0_i32_0 = arith.constant 0 : i32
    %c0_i32_1 = arith.constant 0 : i32
    return %c0_i32, %c0_i32_0 : i32, i32
  }
}

</mosaic_0001>

<bundles_post_ra>
// kernel: tpu_custom_call.1
= control target key start
LH: loop header
LB: loop body
LE: loop exit
PB: predicated region body
PF: predicated region fallthrough
CT: control target
= control target key end

     0   :  { %6 = vsyncpa [#allocation5], 0  ;;  %s2240_s0 = inlined_call_operand.hbm [shape: f32[3,24,128], index: 0, kind: input, shape index: {}]   ;;  %s2241_s1 = inlined_call_operand.hbm [shape: f32[1,1], index: 1, kind: output, shape index: {}]  }
   0x1   :  { %7 = vsyncpa [#allocation6], 0  ;;  %s12_s8 = sshll.u32 %s2240_s0, 4  ;;  %s1530_s9 = smov [#allocation4]   ;;  %s13_s8 = int_to_ptr.hbm [resolvable:$true] %s12_s8 }
   0x2   :  { %s14_s10 = sshll.u32 %s1530_s9, 4  ;;  %s1531_s11 = smov 128   ;;  %s15_s10 = int_to_ptr.vmem [resolvable:$true] %s14_s10 }
   0x3   :  { %s1532_s12 = smov 8  }
   0x4   :  { %20 = dma.hbm_to_vmem [thread:$0]  %s13_s8, 1152, %s15_s10, [#allocation5], %s1531_s11, %s1531_s11, %s1532_s12  }
   0x5   :  { %1526 = dma.done.wait [#allocation5], 1152  }
   0x6   :  { %1527 = vsyncadd [#allocation5], 4294966144  ;;  %vm32_vm0 = vcmask 7168   ;;  %v1533_v0 = vmov 0   ;;  %v1534_v1 = vmov 0.0   ;;  %v1566_v2 = vld [vmem:[#allocation4] sm:$0xff] }
   0x7   :  { %1462 = vset.pattern.permute.xlu0 %v1533_v0  ;;  %35 = vst.msk [vmem:[#allocation3 + $0x10] sm:$0xff] %vm32_vm0, %v1534_v1  ;;  %1460 = vset.pattern.permute.xlu1 %v1533_v0  ;;  %v1568_v3 = vld [vmem:[#allocation4 + $0x18] sm:$0xff]  ;;  %v1570_v4 = vld [vmem:[#allocation4 + $0x30] sm:$0xff]  ;;  %v62_v6 = vmul.f32 %v1566_v2, %v1566_v2  ;;  %v57_v10 = vld [vmem:[#allocation4 + $0x28] sm:$0xff]  ;;  %s1541_s0 = smov 1   ;;  %s1542_s13 = smov [#allocation7]  }
   0x8   :  { %33 = vst.msk [vmem:[#allocation3] sm:$0xff] %vm32_vm0, %v1534_v1  ;;  %1461 = vset.pattern.permute.xlu2 %v1533_v0  ;;  %v65_v7 = vmul.f32 %v1568_v3, %v1568_v3  ;;  %v71_v8 = vmul.f32 %v1570_v4, %v1570_v4  ;;  %v53_v9 = vld [vmem:[#allocation4 + $0x10] sm:$0xff]  ;;  %v61_v12 = vld [vmem:[#allocation4 + $0x40] sm:$0xff]  ;;  %v67_v14 = vmul.f32 %v57_v10, %v57_v10  ;;  %v52_v15 = vld [vmem:[#allocation4 + $0x8] sm:$0xff]  ;;  %s1415_s14 = sshll.u32 %s1542_s13, 4  ;;  %s1417_s17 = sshll.u32 %s2241_s1, 4  ;;  %s1416_s14 = int_to_ptr.vmem [resolvable:$true] %s1415_s14  ;;  %s1418_s17 = int_to_ptr.hbm [resolvable:$true] %s1417_s17 }
   0x9   :  { %34 = vst.msk [vmem:[#allocation3 + $0x8] sm:$0xff] %vm32_vm0, %v1534_v1  ;;  %v64_v13 = vmul.f32 %v53_v9, %v53_v9  ;;  %v73_v17 = vmul.f32 %v61_v12, %v61_v12  ;;  %v56_v18 = vld [vmem:[#allocation4 + $0x20] sm:$0xff]  ;;  %v60_v19 = vld [vmem:[#allocation4 + $0x38] sm:$0xff]  ;;  %v63_v20 = vmul.f32 %v52_v15, %v52_v15 }
   0xa   :  { %36 = vst.msk [vmem:[#allocation3 + $0x18] sm:$0xff] %vm32_vm0, %v1534_v1  ;;  %v68_v16 = vadd.f32 %v65_v7, %v62_v6  ;;  %v66_v22 = vmul.f32 %v56_v18, %v56_v18  ;;  %v72_v24 = vmul.f32 %v60_v19, %v60_v19 }
   0xb   :  { %37 = vst.msk [vmem:[#allocation3 + $0x20] sm:$0xff] %vm32_vm0, %v1534_v1  ;;  %v70_v21 = vadd.f32 %v67_v14, %v64_v13 }
   0xc   :  { %38 = vst.msk [vmem:[#allocation3 + $0x28] sm:$0xff] %vm32_vm0, %v1534_v1  ;;  %v1583_v23 = vadd.f32 %v71_v8, %v68_v16  ;;  %v69_v26 = vadd.f32 %v66_v22, %v63_v20 }
   0xd   :  { %39 = vst.msk [vmem:[#allocation3 + $0x30] sm:$0xff] %vm32_vm0, %v1534_v1  ;;  %v1586_v25 = vadd.f32 %v73_v17, %v70_v21 }
   0xe   :  { %v1105_v5 = vld [vmem:[#allocation3 + $0x10] sm:$0xff]  ;;  %40 = vst.msk [vmem:[#allocation3 + $0x38] sm:$0xff] %vm32_vm0, %v1534_v1  ;;  %vm77_vm1 = vcmp.lt.f32.partialorder %v1583_v23, 1e-08  ;;  %v1599_v31 = vadd.f32 %v72_v24, %v69_v26 }
   0xf   :  { %1122 = vperm.xlu0 %1462, %v1105_v5   ;;  %41 = vst.msk [vmem:[#allocation3 + $0x40] sm:$0xff] %vm32_vm0, %v1534_v1  ;;  %v1103_v11 = vld [vmem:[#allocation3] sm:$0xff]  ;;  %v80_v29 = vsel %vm77_vm1, 1.0, %v1583_v23  ;;  %vm79_vm2 = vcmp.lt.f32.partialorder %v1586_v25, 1e-08 }
  0x10   :  { %42 = vst.msk [vmem:[#allocation3 + $0x48] sm:$0xff] %vm32_vm0, %v1534_v1  ;;  %1112 = vperm.xlu1 %1460, %v1103_v11   ;;  %1463 = vrsqrt.f32 %v80_v29  ;;  %v82_v30 = vsel %vm79_vm2, 1.0, %v1586_v25  ;;  %vm78_vm3 = vcmp.lt.f32.partialorder %v1599_v31, 1e-08  ;;  %v1104_v39 = vld [vmem:[#allocation3 + $0x8] sm:$0xff]  ;;  %vm89_vm4 = vweird.f32 %v80_v29 }
  0x11   :  { %43 = vst.msk [vmem:[#allocation3 + $0x50] sm:$0xff] %vm32_vm0, %v1534_v1  ;;  %v1153_v28 = vld [vmem:[#allocation3 + $0x18] sm:$0xff]  ;;  %1465 = vrsqrt.f32 %v82_v30  ;;  %v81_v32 = vsel %vm78_vm3, 1.0, %v1599_v31  ;;  %1117 = vperm.xlu2 %1461, %v1104_v39   ;;  %vm109_vm6 = vweird.f32 %v82_v30 }
  0x12   :  { %44 = vst.msk [vmem:[#allocation3 + $0x58] sm:$0xff] %vm32_vm0, %v1534_v1  ;;  %1467 = vrsqrt.f32 %v81_v32  ;;  %v1154_v50 = vld [vmem:[#allocation3 + $0x20] sm:$0xff]  ;;  %vm99_vm10 = vweird.f32 %v81_v32 }
  0x13   :  { %45 = vst.msk [vmem:[#allocation3 + $0x60] sm:$0xff] %vm32_vm0, %v1534_v1  ;;  %v1155_v9 = vld [vmem:[#allocation3 + $0x28] sm:$0xff] }
  0x14   :  { %46 = vst.msk [vmem:[#allocation3 + $0x68] sm:$0xff] %vm32_vm0, %v1534_v1  ;;  %v1202_v27 = vld [vmem:[#allocation3 + $0x30] sm:$0xff] }
  0x15   :  { %47 = vst.msk [vmem:[#allocation3 + $0x70] sm:$0xff] %vm32_vm0, %v1534_v1  ;;  %v1203_v36 = vld [vmem:[#allocation3 + $0x38] sm:$0xff] }
  0x16   :  { %48 = vst.msk [vmem:[#allocation3 + $0x78] sm:$0xff] %vm32_vm0, %v1534_v1  ;;  %v1464_v33 = vpop.eup %1463  ;;  %v1204_v34 = vld [vmem:[#allocation3 + $0x40] sm:$0xff] }
  0x17   :  { %49 = vst.msk [vmem:[#allocation3 + $0x80] sm:$0xff] %vm32_vm0, %v1534_v1  ;;  %1210 = vperm.xlu0 %1462, %v1202_v27   ;;  %v1466_v35 = vpop.eup %1465  ;;  %v84_v37 = vmul.f32 %v1464_v33, %v80_v29  ;;  %vm90_vm5 = vweird.f32 %v1464_v33  ;;  %v1245_v47 = vld [vmem:[#allocation3 + $0x48] sm:$0xff] }
  0x18   :  { %50 = vst.msk [vmem:[#allocation3 + $0x88] sm:$0xff] %vm32_vm0, %v1534_v1  ;;  %1161 = vperm.xlu1 %1460, %v1153_v28   ;;  %v104_v38 = vmul.f32 %v1466_v35, %v82_v30  ;;  %v1468_v43 = vpop.eup %1467  ;;  %vm110_vm7 = vweird.f32 %v1466_v35  ;;  %vm91_vm8 = vmor %vm89_vm4, %vm90_vm5  ;;  %v1246_v49 = vld [vmem:[#allocation3 + $0x50] sm:$0xff] }
  0x19   :  { %v85_v40 = vmul.f32 %v1464_v33, %v84_v37  ;;  %v94_v46 = vmul.f32 %v1468_v43, %v81_v32  ;;  %vm111_vm9 = vmor %vm109_vm6, %vm110_vm7  ;;  %1166 = vperm.xlu2 %1461, %v1154_v50   ;;  %vm100_vm11 = vweird.f32 %v1468_v43  ;;  %v1247_v5 = vld [vmem:[#allocation3 + $0x58] sm:$0xff]  ;;  %v1535_v32 = vmov 683565275  }
  0x1a   :  { %v105_v41 = vmul.f32 %v1466_v35, %v104_v38  ;;  %vm101_vm12 = vmor %vm99_vm10, %vm100_vm11  ;;  %v1291_v22 = vld [vmem:[#allocation3 + $0x60] sm:$0xff]  ;;  %v1538_v38 = vmov 2102212464  }
  0x1b   :  { %v86_v42 = vmul.f32 0.5, %v85_v40  ;;  %v95_v52 = vmul.f32 %v1468_v43, %v94_v46  ;;  %v1292_v8 = vld [vmem:[#allocation3 + $0x68] sm:$0xff]  ;;  %v1539_v40 = vmov 920167782  }
  0x1c   :  { %v106_v44 = vmul.f32 0.5, %v105_v41 }
  0x1d   :  { %v87_v45 = vsub.f32 1.5, %v86_v42  ;;  %v96_v55 = vmul.f32 0.5, %v95_v52 }
  0x1e   :  { %v107_v48 = vsub.f32 1.5, %v106_v44 }
  0x1f   :  { %1220 = vperm.xlu0 %1462, %v1204_v34   ;;  %v88_v51 = vmul.f32 %v1464_v33, %v87_v45  ;;  %v97_v59 = vsub.f32 1.5, %v96_v55  ;;  %v1536_v34 = vmov 2475754826  }
  0x20   :  { %1215 = vperm.xlu1 %1460, %v1203_v36   ;;  %v108_v53 = vmul.f32 %v1466_v35, %v107_v48  ;;  %v1537_v36 = vmov 2131351028  }
  0x21   :  { %v1607_v54 = vsel %vm91_vm8, %v1464_v33, %v88_v51  ;;  %v98_v1 = vmul.f32 %v1468_v43, %v97_v59  ;;  %1171 = vperm.xlu2 %1461, %v1155_v9  }
  0x22   :  { %v1611_v56 = vmul.f32 %v1607_v54, %v1583_v23  ;;  %v1613_v57 = vsel %vm111_vm9, %v1466_v35, %v108_v53 }
  0x23   :  { %v1617_v58 = vmul.f32 %v1613_v57, %v1586_v25  ;;  %v1625_v12 = vsel %vm101_vm12, %v1468_v43, %v98_v1  ;;  %v1293_v1 = vld [vmem:[#allocation3 + $0x70] sm:$0xff] }
  0x24   :  { %v116_v60 = vand.u32 2147483647, %v1611_v56  ;;  %v119_v61 = vand.u32 2139095040, %v1611_v56  ;;  %v1631_v18 = vmul.f32 %v1625_v12, %v1599_v31 }
  0x25   :  { %v426_v62 = vand.u32 2147483647, %v1617_v58  ;;  %v429_v63 = vand.u32 2139095040, %v1617_v58 }
  0x26   :  { %v120_v6 = vshrl.u32 %v119_v61, 23  ;;  %v123_v7 = vand.u32 8388607, %v116_v60  ;;  %v274_v29 = vand.u32 2139095040, %v1631_v18 }
  0x27   :  { %1253 = vperm.xlu0 %1462, %v1245_v47   ;;  %v430_v10 = vshrl.u32 %v429_v63, 23  ;;  %v433_v15 = vand.u32 8388607, %v426_v62 }
  0x28   :  { %1258 = vperm.xlu1 %1460, %v1246_v49   ;;  %v1427_v11 = vadd.s32 4294967169, %v120_v6  ;;  %v124_v13 = vor.u32 8388608, %v123_v7  ;;  %v1540_v49 = vmov 1326507024  }
  0x29   :  { %v1433_v14 = vadd.s32 4294967169, %v430_v10  ;;  %v434_v21 = vor.u32 8388608, %v433_v15 }
  0x2a   :  { %v126_v16 = vadd.s32 1, %v1427_v11  ;;  %v1633_v20 = vshll.u32 %v124_v13, 8 }
  0x2b   :  { %v436_v17 = vadd.s32 1, %v1433_v14  ;;  %v1646_v43 = vshll.u32 %v434_v21, 8 }
  0x2c   :  { %vm127_vm13 = vcmp.gt.s32.totalorder %v126_v16, 0  ;;  %v165_v42 = vand.u32 65535, %v1633_v20  ;;  %v166_v47 = vshrl.u32 %v1633_v20, 16 }
  0x2d   :  { %v128_v19 = vsel %vm127_vm13, %v126_v16, 0  ;;  %vm437_vm14 = vcmp.gt.s32.totalorder %v436_v17, 0 }
  0x2e   :  { %v130_v24 = vand.u32 31, %v128_v19  ;;  %v438_v26 = vsel %vm437_vm14, %v436_v17, 0  ;;  %v1635_v27 = vshrl.u32 %v128_v19, 5 }
  0x2f   :  { %1263 = vperm.xlu0 %1462, %v1247_v5   ;;  %v1637_v28 = vand.u32 31, %v438_v26  ;;  %v1666_v7 = vshrl.u32 %v438_v26, 5 }
  0x30   :  { %1304 = vperm.xlu1 %1460, %v1292_v8   ;;  %v131_v30 = vsub.s32 32, %v130_v24  ;;  %v133_v33 = vshll.u32 %v1535_v32, %v130_v24  ;;  %v136_v35 = vshll.u32 %v1536_v34, %v130_v24  ;;  %v139_v37 = vshll.u32 %v1537_v36, %v130_v24 }
  0x31   :  { %v142_v39 = vshll.u32 %v1538_v38, %v130_v24  ;;  %v145_v41 = vshll.u32 %v1539_v40, %v130_v24  ;;  %vm148_vm15 = vcmp.lt.s32.totalorder %v1635_v27, 1  ;;  %vm151_vm4 = vcmp.lt.s32.totalorder %v1635_v27, 4 }
  0x32   :  { %v134_v44 = vshrl.u32 %v1536_v34, %v131_v30  ;;  %v137_v45 = vshrl.u32 %v1537_v36, %v131_v30  ;;  %v140_v46 = vshrl.u32 %v1538_v38, %v131_v30  ;;  %v143_v48 = vshrl.u32 %v1539_v40, %v131_v30 }
  0x33   :  { %v146_v50 = vshrl.u32 %v1540_v49, %v131_v30  ;;  %v1657_v55 = vsub.s32 32, %v1637_v28  ;;  %v132_v59 = vshrl.u32 %v1535_v32, %v131_v30  ;;  %vm150_vm5 = vcmp.lt.s32.totalorder %v1635_v27, 3 }
  0x34   :  { %v135_v51 = vor.u32 %v134_v44, %v133_v33  ;;  %v138_v52 = vor.u32 %v137_v45, %v136_v35  ;;  %v141_v53 = vor.u32 %v140_v46, %v139_v37  ;;  %v144_v61 = vor.u32 %v143_v48, %v142_v39 }
  0x35   :  { %v147_v63 = vor.u32 %v146_v50, %v145_v41  ;;  %vm149_vm6 = vcmp.lt.s32.totalorder %v1635_v27, 2  ;;  %v443_v10 = vshll.u32 %v1535_v32, %v1637_v28  ;;  %v446_v11 = vshll.u32 %v1536_v34, %v1637_v28 }
  0x36   :  { %v156_v5 = vsel %vm148_vm15, %v135_v51, %v138_v52  ;;  %v160_v6 = vsel %vm148_vm15, %v138_v52, %v141_v53  ;;  %v157_v8 = vsel %vm151_vm4, %v144_v61, 920167782  ;;  %v153_v13 = vsel %vm151_vm4, %v141_v53, 2102212464 }
  0x37   :  { %1299 = vperm.xlu0 %1462, %v1291_v22   ;;  %v161_v9 = vsel %vm151_vm4, %v147_v63, 1326507024  ;;  %v158_v14 = vsel %vm150_vm5, %v141_v53, %v157_v8  ;;  %v444_v16 = vshrl.u32 %v1536_v34, %v1657_v55  ;;  %v152_v17 = vsel %vm148_vm15, %v132_v59, %v135_v51 }
  0x38   :  { %v162_v15 = vsel %vm150_vm5, %v144_v61, %v161_v9  ;;  %v159_v19 = vsel %vm149_vm6, %v156_v5, %v158_v14  ;;  %v447_v22 = vshrl.u32 %v1537_v36, %v1657_v55  ;;  %v154_v35 = vsel %vm150_vm5, %v138_v52, %v153_v13 }
  0x39   :  { %v163_v21 = vsel %vm149_vm6, %v160_v6, %v162_v15  ;;  %v189_v30 = vand.u32 65535, %v159_v19  ;;  %v190_v33 = vshrl.u32 %v159_v19, 16  ;;  %v1694_v37 = vor.u32 %v444_v16, %v443_v10 }
  0x3a   :  { %v167_v24 = vand.u32 65535, %v163_v21  ;;  %v168_v26 = vshrl.u32 %v163_v21, 16  ;;  %v1696_v39 = vor.u32 %v447_v22, %v446_v11  ;;  %v449_v41 = vshll.u32 %v1537_v36, %v1637_v28 }
  0x3b   :  { %v450_v48 = vshrl.u32 %v1538_v38, %v1657_v55  ;;  %v191_v51 = vmul.u32 %v189_v30, %v165_v42  ;;  %v192_v53 = vmul.u32 %v190_v33, %v165_v42  ;;  %v193_v59 = vmul.u32 %v189_v30, %v166_v47 }
  0x3c   :  { %v169_v44 = vmul.u32 %v167_v24, %v165_v42  ;;  %v170_v45 = vmul.u32 %v168_v26, %v165_v42  ;;  %v171_v46 = vmul.u32 %v167_v24, %v166_v47  ;;  %v172_v50 = vmul.u32 %v168_v26, %v166_v47 }
  0x3d   :  { %v195_v6 = vshll.u32 %v192_v53, 16  ;;  %v196_v8 = vshrl.u32 %v192_v53, 16  ;;  %v197_v9 = vshll.u32 %v193_v59, 16  ;;  %v198_v11 = vshrl.u32 %v193_v59, 16 }
  0x3e   :  { %v173_v61 = vshll.u32 %v170_v45, 16  ;;  %v174_v63 = vshrl.u32 %v170_v45, 16  ;;  %v175_v52 = vshll.u32 %v171_v46, 16  ;;  %v176_v5 = vshrl.u32 %v171_v46, 16 }
  0x3f   :  { %1309 = vperm.xlu0 %1462, %v1293_v1   ;;  %v194_v1 = vmul.u32 %v190_v33, %v166_v47  ;;  %v452_v13 = vshll.u32 %v1538_v38, %v1637_v28  ;;  %vm199_vm8 = vc.u32 %v191_v51, %v195_v6  ;;  %v201_v15 = vadd.s32 %v195_v6, %v191_v51 }
  0x40   :  { %vm177_vm7 = vc.u32 %v169_v44, %v173_v61  ;;  %v179_v10 = vadd.s32 %v173_v61, %v169_v44  ;;  %v453_v42 = vshrl.u32 %v1539_v40, %v1657_v55  ;;  %v200_v47 = vsel %vm199_vm8, 1, %v1533_v0 }
  0x41   :  { %v178_v14 = vsel %vm177_vm7, 1, %v1533_v0  ;;  %v455_v19 = vshll.u32 %v1539_v40, %v1637_v28  ;;  %v202_v22 = vadd.s32 %v200_v47, %v194_v1  ;;  %vm203_vm10 = vc.u32 %v201_v15, %v197_v9 }
  0x42   :  { %v180_v16 = vadd.s32 %v178_v14, %v172_v50  ;;  %vm181_vm9 = vc.u32 %v179_v10, %v175_v52  ;;  %v451_v24 = vor.u32 %v450_v48, %v449_v41  ;;  %v204_v30 = vsel %vm203_vm10, 1, %v1533_v0 }
  0x43   :  { %v182_v21 = vsel %vm181_vm9, 1, %v1533_v0  ;;  %v454_v33 = vor.u32 %v453_v42, %v452_v13  ;;  %v456_v44 = vshrl.u32 %v1540_v49, %v1657_v55  ;;  %v1714_v45 = vadd.s32 %v201_v15, %v197_v9 }
  0x44   :  { %v184_v26 = vadd.s32 %v182_v21, %v180_v16  ;;  %v206_v46 = vadd.s32 %v204_v30, %v202_v22  ;;  %vm458_vm11 = vcmp.lt.s32.totalorder %v1666_v7, 1  ;;  %vm460_vm12 = vcmp.lt.s32.totalorder %v1666_v7, 3 }
  0x45   :  { %v457_v50 = vor.u32 %v456_v44, %v455_v19  ;;  %vm459_vm13 = vcmp.lt.s32.totalorder %v1666_v7, 2  ;;  %vm461_vm14 = vcmp.lt.s32.totalorder %v1666_v7, 4  ;;  %v155_v41 = vsel %vm149_vm6, %v152_v17, %v154_v35 }
  0x46   :  { %v185_v28 = vadd.s32 %v184_v26, %v174_v63  ;;  %v207_v48 = vadd.s32 %v206_v46, %v196_v8  ;;  %v466_v51 = vsel %vm458_vm11, %v1694_v37, %v1696_v39  ;;  %v467_v53 = vsel %vm461_vm14, %v454_v33, 920167782 }
  0x47   :  { %v468_v61 = vsel %vm460_vm12, %v451_v24, %v467_v53  ;;  %v470_v63 = vsel %vm458_vm11, %v1696_v39, %v451_v24  ;;  %v475_v27 = vand.u32 65535, %v1646_v43  ;;  %v471_v52 = vsel %vm461_vm14, %v457_v50, 1326507024 }
  0x48   :  { %v1728_v59 = vadd.s32 %v185_v28, %v176_v5  ;;  %v208_v17 = vadd.s32 %v207_v48, %v198_v11  ;;  %v469_v35 = vsel %vm459_vm13, %v466_v51, %v468_v61  ;;  %v476_v1 = vshrl.u32 %v1646_v43, 16 }
  0x49   :  { %v209_v5 = vmul.u32 %v1633_v20, %v155_v41  ;;  %v472_v6 = vsel %vm460_vm12, %v454_v33, %v471_v52  ;;  %v499_v8 = vand.u32 65535, %v469_v35  ;;  %v500_v11 = vshrl.u32 %v469_v35, 16 }
  0x4a   :  { %vm211_vm15 = vc.u32 %v1728_v59, %v1714_v45  ;;  %v212_v9 = vadd.s32 1, %v208_v17  ;;  %v473_v10 = vsel %vm459_vm13, %v470_v63, %v472_v6  ;;  %v275_v13 = vshrl.u32 %v274_v29, 23 }
  0x4b   :  { %v477_v14 = vand.u32 65535, %v473_v10  ;;  %v478_v15 = vshrl.u32 %v473_v10, 16  ;;  %v442_v20 = vshrl.u32 %v1535_v32, %v1657_v55  ;;  %v502_v16 = vmul.u32 %v500_v11, %v475_v27 }
  0x4c   :  { %v213_v42 = vsel %vm211_vm15, %v212_v9, %v208_v17  ;;  %v503_v47 = vmul.u32 %v499_v8, %v476_v1  ;;  %v501_v26 = vmul.u32 %v499_v8, %v475_v27  ;;  %v1430_v44 = vadd.s32 4294967169, %v275_v13 }
  0x4d   :  { %v214_v19 = vadd.s32 %v213_v42, %v209_v5  ;;  %v479_v21 = vmul.u32 %v477_v14, %v475_v27  ;;  %v480_v22 = vmul.u32 %v478_v15, %v475_v27  ;;  %v481_v30 = vmul.u32 %v477_v14, %v476_v1 }
  0x4e   :  { %v505_v33 = vshll.u32 %v502_v16, 16  ;;  %v463_v28 = vsel %vm461_vm14, %v451_v24, 2102212464  ;;  %v482_v29 = vmul.u32 %v478_v15, %v476_v1  ;;  %v462_v41 = vsel %vm458_vm11, %v442_v20, %v1694_v37 }
  0x4f   :  { %v215_v46 = vadd.s32 536870912, %v214_v19  ;;  %v483_v50 = vshll.u32 %v480_v22, 16  ;;  %v485_v55 = vshll.u32 %v481_v30, 16  ;;  %v504_v48 = vmul.u32 %v500_v11, %v476_v1 }
  0x50   :  { %v507_v51 = vshll.u32 %v503_v47, 16  ;;  %vm509_vm5 = vc.u32 %v501_v26, %v505_v33  ;;  %v464_v63 = vsel %vm460_vm12, %v1696_v39, %v463_v28  ;;  %v511_v17 = vadd.s32 %v505_v33, %v501_v26 }
  0x51   :  { %v1757_v53 = vshrl.u32 %v215_v46, 30  ;;  %vm487_vm4 = vc.u32 %v479_v21, %v483_v50  ;;  %v489_v61 = vadd.s32 %v483_v50, %v479_v21  ;;  %v510_v27 = vsel %vm509_vm5, 1, %v1533_v0 }
  0x52   :  { %v488_v24 = vsel %vm487_vm4, 1, %v1533_v0  ;;  %v484_v37 = vshrl.u32 %v480_v22, 16  ;;  %v506_v5 = vshrl.u32 %v502_v16, 16  ;;  %v512_v6 = vadd.s32 %v510_v27, %v504_v48 }
  0x53   :  { %v217_v35 = vshll.u32 %v1757_v53, 30  ;;  %v490_v52 = vadd.s32 %v488_v24, %v482_v29  ;;  %vm491_vm6 = vc.u32 %v489_v61, %v485_v55  ;;  %vm513_vm7 = vc.u32 %v511_v17, %v507_v51 }
  0x54   :  { %v492_v1 = vsel %vm491_vm6, 1, %v1533_v0  ;;  %v486_v9 = vshrl.u32 %v481_v30, 16  ;;  %v514_v39 = vsel %vm513_vm7, 1, %v1533_v0  ;;  %v508_v11 = vshrl.u32 %v503_v47, 16 }
  0x55   :  { %v218_v8 = vsub.s32 %v214_v19, %v217_v35  ;;  %v494_v10 = vadd.s32 %v492_v1, %v490_v52  ;;  %v516_v13 = vadd.s32 %v514_v39, %v512_v6  ;;  %v281_v14 = vadd.s32 1, %v1430_v44 }
  0x56   :  { %v1767_v20 = vadd.s32 %v511_v17, %v507_v51  ;;  %v465_v21 = vsel %vm459_vm13, %v462_v41, %v464_v63  ;;  %v271_v29 = vand.u32 2147483647, %v1631_v18  ;;  %v210_v50 = vadd.s32 %v1714_v45, %v1728_v59 }
  0x57   :  { %vm219_vm8 = vcmp.lt.s32.totalorder %v218_v8, 0  ;;  %v220_v15 = vsub.s32 0, %v218_v8  ;;  %v495_v42 = vadd.s32 %v494_v10, %v484_v37  ;;  %v517_v22 = vadd.s32 %v516_v13, %v506_v5 }
  0x58   :  { %vm282_vm9 = vcmp.gt.s32.totalorder %v281_v14, 0  ;;  %v519_v47 = vmul.u32 %v1646_v43, %v465_v21  ;;  %vm118_vm12 = vcmp.lt.s32.totalorder %v1611_v56, 0  ;;  %v278_v27 = vand.u32 8388607, %v271_v29 }
  0x59   :  { %v221_v16 = vsel %vm219_vm8, %v220_v15, %v218_v8  ;;  %v1771_v26 = vadd.s32 %v495_v42, %v486_v9  ;;  %v283_v19 = vsel %vm282_vm9, %v281_v14, 0  ;;  %v518_v33 = vadd.s32 %v517_v22, %v508_v11 }
  0x5a   :  { %v222_v30 = vclz %v221_v16  ;;  %v285_v46 = vand.u32 31, %v283_v19  ;;  %v240_v52 = vsub.s32 4, %v1757_v53  ;;  %v1793_v13 = vshrl.u32 %v283_v19, 5 }
  0x5b   :  { %vm521_vm10 = vc.u32 %v1771_v26, %v1767_v20  ;;  %v522_v28 = vadd.s32 1, %v518_v33  ;;  %vm1804_vm13 = vcmp.le.f32.partialorder %v116_v60, 0.7853982  ;;  %vm428_vm7 = vcmp.lt.s32.totalorder %v1617_v58, 0 }
  0x5c   :  { %v1428_v44 = vadd.s32 4294967294, %v222_v30  ;;  %v286_v7 = vsub.s32 32, %v285_v46  ;;  %v288_v51 = vshll.u32 %v1535_v32, %v285_v46  ;;  %v291_v45 = vshll.u32 %v1536_v34, %v285_v46 }
  0x5d   :  { %v523_v41 = vsel %vm521_vm10, %v522_v28, %v518_v33  ;;  %v294_v59 = vshll.u32 %v1537_v36, %v285_v46  ;;  %v297_v6 = vshll.u32 %v1538_v38, %v285_v46  ;;  %v300_v14 = vshll.u32 %v1539_v40, %v285_v46 }
  0x5e   :  { %vm1429_vm11 = vcmp.lt.s32.totalorder %v1428_v44, 0  ;;  %v524_v48 = vadd.s32 %v523_v41, %v519_v47  ;;  %v289_v17 = vshrl.u32 %v1536_v34, %v286_v7  ;;  %v292_v10 = vshrl.u32 %v1537_v36, %v286_v7 }
  0x5f   :  { %v225_v55 = vsel %vm1429_vm11, 0, %v1428_v44  ;;  %v295_v39 = vshrl.u32 %v1538_v38, %v286_v7  ;;  %v298_v34 = vshrl.u32 %v1539_v40, %v286_v7  ;;  %v241_v16 = vsel %vm118_vm12, %v240_v52, %v1757_v53 }
  0x60   :  { %v226_v61 = vsub.s32 32, %v225_v55  ;;  %v227_v63 = vshll.u32 %v218_v8, %v225_v55  ;;  %v230_v43 = vsub.s32 4294967266, %v225_v55  ;;  %v525_v24 = vadd.s32 536870912, %v524_v48 }
  0x61   :  { %v290_v5 = vor.u32 %v289_v17, %v288_v51  ;;  %v293_v21 = vor.u32 %v292_v10, %v291_v45  ;;  %v296_v22 = vor.u32 %v295_v39, %v294_v59  ;;  %v299_v36 = vor.u32 %v298_v34, %v297_v6 }
  0x62   :  { %v228_v35 = vshrl.u32 %v210_v50, %v226_v61  ;;  %v231_v37 = vadd.s32 127, %v230_v43  ;;  %v1787_v1 = vshrl.u32 %v525_v24, 30  ;;  %v287_v38 = vshrl.u32 %v1535_v32, %v286_v7 }
  0x63   :  { %v301_v19 = vshrl.u32 %v1540_v49, %v286_v7  ;;  %v279_v46 = vor.u32 8388608, %v278_v27  ;;  %v243_v53 = vsel %vm1804_vm13, 0, %v241_v16  ;;  %vm303_vm15 = vcmp.lt.s32.totalorder %v1793_v13, 1 }
  0x64   :  { %v229_v8 = vor.u32 %v228_v35, %v227_v63  ;;  %v232_v9 = vshll.u32 %v231_v37, 23  ;;  %v527_v11 = vshll.u32 %v1787_v1, 30  ;;  %vm304_vm4 = vcmp.lt.s32.totalorder %v1793_v13, 2 }
  0x65   :  { %v302_v28 = vor.u32 %v301_v19, %v300_v14  ;;  %vm305_vm5 = vcmp.lt.s32.totalorder %v1793_v13, 3  ;;  %vm306_vm6 = vcmp.lt.s32.totalorder %v1793_v13, 4  ;;  %v307_v49 = vsel %vm303_vm15, %v287_v38, %v290_v5 }
  0x66   :  { %v233_v15 = vor.u32 4788187, %v232_v9  ;;  %v236_v42 = vcvt.s32.f32 %v229_v8  ;;  %v528_v30 = vsub.s32 %v524_v48, %v527_v11  ;;  %v308_v7 = vsel %vm306_vm6, %v296_v22, 2102212464 }
  0x67   :  { %v309_v41 = vsel %vm305_vm5, %v293_v21, %v308_v7  ;;  %v311_v55 = vsel %vm303_vm15, %v290_v5, %v293_v21  ;;  %v312_v48 = vsel %vm306_vm6, %v299_v36, 920167782  ;;  %v315_v51 = vsel %vm303_vm15, %v293_v21, %v296_v22 }
  0x68   :  { %v234_v33 = vand.u32 2147483647, %v233_v15  ;;  %vm529_vm14 = vcmp.lt.s32.totalorder %v528_v30, 0  ;;  %v530_v40 = vsub.s32 0, %v528_v30  ;;  %v1825_v43 = vsel %vm304_vm4, %v307_v49, %v309_v41 }
  0x69   :  { %v1827_v24 = vshll.u32 %v279_v46, 8  ;;  %v260_v17 = vadd.s32 3, %v243_v53  ;;  %v313_v35 = vsel %vm305_vm5, %v296_v22, %v312_v48  ;;  %v316_v37 = vsel %vm306_vm6, %v302_v28, 1326507024 }
  0x6a   :  { %v237_v44 = vmul.f32 %v236_v42, %v234_v33  ;;  %v531_v50 = vsel %vm529_vm14, %v530_v40, %v528_v30  ;;  %vm1842_vm8 = vcmp.le.f32.partialorder %v426_v62, 0.7853982  ;;  %v520_v52 = vadd.s32 %v1767_v20, %v1771_v26 }
  0x6b   :  { %v532_v32 = vclz %v531_v50  ;;  %v1850_v5 = vsel %vm304_vm4, %v311_v55, %v313_v35  ;;  %v1852_v6 = vand.u32 3, %v243_v53  ;;  %v550_v9 = vsub.s32 4, %v1787_v1 }
  0x6c   :  { %v238_v60 = vxor.u32 2147483648, %v237_v44  ;;  %v317_v10 = vsel %vm305_vm5, %v299_v36, %v316_v37  ;;  %v1857_v14 = vand.u32 3, %v260_v17  ;;  %v1860_v20 = vmul.f32 0.041666668, %v1583_v23 }
  0x6d   :  { %v1434_v63 = vadd.s32 4294967294, %v532_v32  ;;  %v1863_v15 = vand.u32 65535, %v1827_v24  ;;  %v318_v16 = vsel %vm304_vm4, %v315_v51, %v317_v10  ;;  %vm730_vm10 = vcmp.eq.s32.totalorder %v1852_v6, 2 }
  0x6e   :  { %v239_v61 = vsel %vm118_vm12, %v238_v60, %v237_v44  ;;  %v1869_v36 = vmul.f32 0.16666667, %v1583_v23  ;;  %v1872_v33 = vshrl.u32 %v1827_v24, 16  ;;  %v551_v40 = vsel %vm428_vm7, %v550_v9, %v1787_v1 }
  0x6f   :  { %v1832_v27 = vsel %vm1804_vm13, %v1611_v56, %v239_v61  ;;  %vm1435_vm9 = vcmp.lt.s32.totalorder %v1434_v63, 0  ;;  %vm263_vm11 = vcmp.eq.s32.totalorder %v1857_v14, 0  ;;  %vm266_vm12 = vcmp.eq.s32.totalorder %v1857_v14, 2 }
  0x70   :  { %v244_v45 = vmul.f32 %v1832_v27, %v1832_v27  ;;  %v535_v8 = vsel %vm1435_vm9, 0, %v1434_v63  ;;  %vm727_vm13 = vcmp.eq.s32.totalorder %v1852_v6, 0  ;;  %v1882_v13 = vmul.f32 %v1607_v54, %v1607_v54 }
  0x71   :  { %v536_v11 = vsub.s32 32, %v535_v8  ;;  %v537_v34 = vshll.u32 %v528_v30, %v535_v8  ;;  %v540_v26 = vsub.s32 4294967266, %v535_v8  ;;  %v1885_v46 = vmul.f32 0.5, %v1583_v23 }
  0x72   :  { %v245_v62 = vmul.f32 -0.001358992, %v244_v45  ;;  %v252_v39 = vmul.f32 -0.00019511016, %v244_v45  ;;  %vm262_vm14 = vcmp.lt.s32.totalorder %v1857_v14, 2  ;;  %vm726_vm15 = vcmp.lt.s32.totalorder %v1852_v6, 2 }
  0x73   :  { %v538_v22 = vshrl.u32 %v520_v52, %v536_v11  ;;  %v541_v30 = vadd.s32 127, %v540_v26  ;;  %v1058_v1 = vsub.f32 0.5, %v1860_v20  ;;  %v322_v50 = vand.u32 65535, %v318_v16 }
  0x74   :  { %v246_v42 = vadd.f32 0.041655596, %v245_v62  ;;  %v253_v21 = vadd.f32 0.008332121, %v252_v39  ;;  %vm259_vm4 = vweird.f32 %v1611_v56  ;;  %v1893_v49 = vsel %vm1842_vm8, 0, %v551_v40 }
  0x75   :  { %v539_v47 = vor.u32 %v538_v22, %v537_v34  ;;  %v542_v44 = vshll.u32 %v541_v30, 23  ;;  %v323_v7 = vshrl.u32 %v318_v16, 16  ;;  %v1046_v48 = vsub.f32 1.0, %v1869_v36 }
  0x76   :  { %v247_v38 = vmul.f32 %v246_v42, %v244_v45  ;;  %v254_v19 = vmul.f32 %v253_v21, %v244_v45  ;;  %v326_v51 = vmul.u32 %v322_v50, %v1872_v33  ;;  %v1076_v61 = vsub.f32 1.0, %v1885_v46 }
  0x77   :  { %v543_v60 = vor.u32 4788187, %v542_v44  ;;  %v546_v32 = vcvt.s32.f32 %v539_v47  ;;  %v324_v17 = vmul.u32 %v322_v50, %v1863_v15  ;;  %v325_v35 = vmul.u32 %v323_v7, %v1863_v15 }
  0x78   :  { %v248_v53 = vadd.f32 -0.4999988, %v247_v38  ;;  %v255_v28 = vadd.f32 -0.16666654, %v254_v19  ;;  %v1901_v8 = vand.u32 3, %v1893_v49  ;;  %v344_v9 = vand.u32 65535, %v1850_v5 }
  0x79   :  { %v544_v63 = vand.u32 2147483647, %v543_v60  ;;  %v328_v62 = vshll.u32 %v325_v35, 16  ;;  %v330_v39 = vshll.u32 %v326_v51, 16  ;;  %v331_v26 = vshrl.u32 %v326_v51, 16 }
  0x7a   :  { %v249_v41 = vmul.f32 %v248_v53, %v244_v45  ;;  %v256_v55 = vmul.f32 %v255_v28, %v244_v45  ;;  %v327_v45 = vmul.u32 %v323_v7, %v1872_v33  ;;  %v345_v42 = vshrl.u32 %v1850_v5, 16 }
  0x7b   :  { %v547_v10 = vmul.f32 %v546_v32, %v544_v63  ;;  %v329_v22 = vshrl.u32 %v325_v35, 16  ;;  %vm332_vm5 = vc.u32 %v324_v17, %v328_v62  ;;  %v334_v16 = vadd.s32 %v328_v62, %v324_v17 }
  0x7c   :  { %v250_v37 = vadd.f32 1.0, %v249_v41  ;;  %v257_v52 = vadd.f32 1.0, %v256_v55  ;;  %v333_v19 = vsel %vm332_vm5, 1, %v1533_v0  ;;  %v347_v5 = vmul.u32 %v345_v42, %v1863_v15 }
  0x7d   :  { %v548_v21 = vxor.u32 2147483648, %v547_v10  ;;  %v335_v47 = vadd.s32 %v333_v19, %v327_v45  ;;  %vm336_vm6 = vc.u32 %v334_v16, %v330_v39  ;;  %v346_v55 = vmul.u32 %v344_v9, %v1863_v15 }
  0x7e   :  { %v258_v11 = vmul.f32 %v257_v52, %v1832_v27  ;;  %v267_v34 = vxor.u32 2147483648, %v250_v37  ;;  %v337_v53 = vsel %vm336_vm6, 1, %v1533_v0  ;;  %v348_v59 = vmul.u32 %v344_v9, %v1872_v33 }
  0x7f   :  { %v549_v27 = vsel %vm428_vm7, %v548_v21, %v547_v10  ;;  %v339_v32 = vadd.s32 %v337_v53, %v335_v47  ;;  %v349_v17 = vmul.u32 %v345_v42, %v1872_v33  ;;  %v350_v52 = vshll.u32 %v347_v5, 16 }
  0x80   :  { %v264_v36 = vxor.u32 2147483648, %v258_v11  ;;  %v268_v30 = vsel %vm266_vm12, %v267_v34, %v258_v11  ;;  %v732_v38 = vsel %vm730_vm10, %v267_v34, %v258_v11  ;;  %v552_v44 = vsel %vm1842_vm8, %v1617_v58, %v549_v27 }
  0x81   :  { %v554_v60 = vmul.f32 %v552_v44, %v552_v44  ;;  %v352_v10 = vshll.u32 %v348_v59, 16  ;;  %v351_v62 = vshrl.u32 %v347_v5, 16  ;;  %vm354_vm7 = vc.u32 %v346_v55, %v350_v52 }
  0x82   :  { %v265_v40 = vsel %vm263_vm11, %v250_v37, %v264_v36  ;;  %v729_v46 = vsel %vm727_vm13, %v250_v37, %v264_v36  ;;  %v340_v37 = vadd.s32 %v339_v32, %v329_v22  ;;  %v356_v39 = vadd.s32 %v350_v52, %v346_v55 }
  0x83   :  { %v269_v28 = vsel %vm262_vm14, %v265_v40, %v268_v30  ;;  %v733_v50 = vsel %vm726_vm15, %v729_v46, %v732_v38  ;;  %v555_v14 = vmul.f32 -0.001358992, %v554_v60  ;;  %v562_v35 = vmul.f32 -0.00019511016, %v554_v60 }
  0x84   :  { %v270_v7 = vsel %vm259_vm4, nan, %v269_v28  ;;  %v734_v41 = vsel %vm259_vm4, nan, %v733_v50  ;;  %v341_v45 = vadd.s32 %v340_v37, %v331_v26  ;;  %v353_v34 = vshrl.u32 %v348_v59, 16 }
  0x85   :  { %v1049_v51 = vmul.f32 %v270_v7, %v1607_v54  ;;  %v1061_v63 = vsub.f32 1.0, %v734_v41  ;;  %v1937_v6 = vsel %vm77_vm1, %v1076_v61, %v734_v41  ;;  %v556_v9 = vadd.f32 0.041655596, %v555_v14 }
  0x86   :  { %v563_v33 = vadd.f32 0.008332121, %v562_v35  ;;  %vm358_vm8 = vc.u32 %v356_v39, %v352_v10  ;;  %v360_v21 = vadd.s32 %v356_v39, %v352_v10  ;;  %vm1038_vm9 = vcmp.eq.s32.totalorder %v1901_v8, 2 }
  0x87   :  { %v1067_v56 = vmul.f32 %v1882_v13, %v1061_v63  ;;  %v1942_v15 = vsel %vm77_vm1, %v1046_v48, %v1049_v51  ;;  %v557_v13 = vmul.f32 %v556_v9, %v554_v60  ;;  %v359_v22 = vsel %vm358_vm8, 1, %v1533_v0 }
  0x88   :  { %v1946_v54 = vmul.f32 %v1942_v15, %v1570_v4  ;;  %v564_v11 = vmul.f32 %v563_v33, %v554_v60  ;;  %v355_v4 = vsel %vm354_vm7, 1, %v1533_v0  ;;  %v1966_v30 = vadd.s32 %v360_v21, %v341_v45 }
  0x89   :  { %v1952_v61 = vsel %vm77_vm1, %v1058_v1, %v1067_v56  ;;  %v558_v42 = vadd.f32 -0.4999988, %v557_v13  ;;  %v357_v26 = vadd.s32 %v355_v4, %v349_v17  ;;  %vm366_vm1 = vc.u32 %v341_v45, %v360_v21  ;;  %v1997_v56 = vld [vmem:[#allocation4 + $0x10] sm:$0xff] }
  0x8a   :  { %v1956_v48 = vmul.f32 %v1952_v61, %v1566_v2  ;;  %v565_v1 = vadd.f32 -0.16666654, %v564_v11  ;;  %v364_v46 = vmul.u32 %v1827_v24, %v1825_v43  ;;  %vm1035_vm10 = vcmp.eq.s32.totalorder %v1901_v8, 0 }
  0x8b   :  { %v559_v16 = vmul.f32 %v558_v42, %v554_v60  ;;  %v361_v36 = vadd.s32 %v359_v22, %v357_v26  ;;  %vm1034_vm11 = vcmp.lt.s32.totalorder %v1901_v8, 2  ;;  %vm569_vm12 = vweird.f32 %v1617_v58 }
  0x8c   :  { %v1091_v23 = vmul.f32 %v1956_v48, %v1566_v2  ;;  %v1963_v20 = vmul.f32 %v1956_v48, %v1568_v3  ;;  %v566_v2 = vmul.f32 %v565_v1, %v554_v60  ;;  %v1057_v60 = vmul.f32 0.041666668, %v1586_v25 }
  0x8d   :  { %v560_v27 = vadd.f32 1.0, %v559_v16  ;;  %v362_v47 = vadd.s32 %v361_v36, %v351_v62  ;;  %v1075_v43 = vmul.f32 0.5, %v1586_v25  ;;  %v570_v35 = vadd.s32 3, %v1893_v49 }
  0x8e   :  { %v1969_v38 = vadd.f32 %v1091_v23, %v1937_v6  ;;  %v1973_v19 = vsub.f32 %v1963_v20, %v1946_v54  ;;  %v567_v0 = vadd.f32 1.0, %v566_v2  ;;  %v1060_v8 = vsub.f32 0.5, %v1057_v60  ;;  %v2032_v60 = vld [vmem:[#allocation4 + $0x40] sm:$0xff] }
  0x8f   :  { %v577_v3 = vxor.u32 2147483648, %v560_v27  ;;  %v363_v5 = vadd.s32 %v362_v47, %v353_v34  ;;  %v1078_v17 = vsub.f32 1.0, %v1075_v43  ;;  %v571_v45 = vand.u32 3, %v570_v35 }
  0x90   :  { %1097 = vrot.lane.b32.xlu0 %v1969_v38, %s1541_s0  ;;  %1146 = vrot.lane.b32.xlu2 %v1973_v19, %s1541_s0  ;;  %v568_v40 = vmul.f32 %v567_v0, %v552_v44  ;;  %v1066_v44 = vmul.f32 %v1613_v57, %v1613_v57  ;;  %vm273_vm6 = vcmp.lt.s32.totalorder %v1631_v18, 0  ;;  %vm272_vm7 = vcmp.le.f32.partialorder %v271_v29, 0.7853982 }
  0x91   :  { %v367_v53 = vadd.s32 1, %v363_v5  ;;  %vm573_vm14 = vcmp.eq.s32.totalorder %v571_v45, 0  ;;  %vm576_vm15 = vcmp.eq.s32.totalorder %v571_v45, 2  ;;  %vm572_vm4 = vcmp.lt.s32.totalorder %v571_v45, 2 }
  0x92   :  { %v574_v28 = vxor.u32 2147483648, %v568_v40  ;;  %v1040_v50 = vsel %vm1038_vm9, %v577_v3, %v568_v40  ;;  %v578_v42 = vsel %vm576_vm15, %v577_v3, %v568_v40 }
  0x93   :  { %v368_v32 = vsel %vm366_vm1, %v367_v53, %v363_v5 }
  0x94   :  { %v1037_v7 = vsel %vm1035_vm10, %v560_v27, %v574_v28  ;;  %v369_v41 = vadd.s32 %v368_v32, %v364_v46  ;;  %v575_v4 = vsel %vm573_vm14, %v560_v27, %v574_v28  ;;  %v1045_v27 = vmul.f32 0.16666667, %v1586_v25 }
  0x95   :  { %v1041_v55 = vsel %vm1034_vm11, %v1037_v7, %v1040_v50  ;;  %v579_v22 = vsel %vm572_vm4, %v575_v4, %v578_v42  ;;  %v2026_v50 = vld [vmem:[#allocation4 + $0x28] sm:$0xff] }
  0x96   :  { %v1042_v24 = vsel %vm569_vm12, nan, %v1041_v55  ;;  %v370_v59 = vadd.s32 536870912, %v369_v41  ;;  %v580_v2 = vsel %vm569_vm12, nan, %v579_v22  ;;  %v1048_v40 = vsub.f32 1.0, %v1045_v27 }
  0x97   :  { %v1063_v51 = vsub.f32 1.0, %v1042_v24  ;;  %v2005_v33 = vsel %vm79_vm2, %v1078_v17, %v1042_v24  ;;  %v1051_v53 = vmul.f32 %v580_v2, %v1613_v57  ;;  %v1472_v17 = vld [vmem:[#allocation4 + $0x30] sm:$0xff]  ;;  %v1044_v22 = vmul.f32 0.16666667, %v1599_v31 }
  0x98   :  { %v371_v63 = vshrl.u32 %v370_v59, 30  ;;  %v1186_v35 = vmul.f32 %v1472_v17, %v1956_v48  ;;  %vm414_vm12 = vweird.f32 %v1631_v18  ;;  %v1074_v27 = vmul.f32 0.5, %v1599_v31 }
  0x99   :  { %v1069_v14 = vmul.f32 %v1066_v44, %v1063_v51 }
  0x9a   :  { %v372_v37 = vshll.u32 %v371_v63, 30  ;;  %v395_v7 = vsub.s32 4, %v371_v63 }
  0x9b   :  { %v1995_v52 = vsel %vm79_vm2, %v1060_v8, %v1069_v14 }
  0x9c   :  { %v2001_v9 = vmul.f32 %v1997_v56, %v1995_v52  ;;  %v373_v10 = vsub.s32 %v369_v41, %v372_v37  ;;  %v396_v44 = vsel %vm273_vm6, %v395_v7, %v371_v63  ;;  %v1473_v37 = vld [vmem:[#allocation4 + $0x18] sm:$0xff] }
  0x9d   :  { %v398_v59 = vsel %vm272_vm7, 0, %v396_v44  ;;  %v1077_v44 = vsub.f32 1.0, %v1074_v27  ;;  %v1113_v27 = vpop.permute.xlu1 %1112 }
  0x9e   :  { %v1093_v49 = vmul.f32 %v1997_v56, %v2001_v9  ;;  %vm374_vm13 = vcmp.lt.s32.totalorder %v373_v10, 0  ;;  %v375_v62 = vsub.s32 0, %v373_v10  ;;  %v2030_v57 = vmul.f32 %v2026_v50, %v2001_v9 }
  0x9f   :  { %v415_v14 = vadd.s32 3, %v398_v59  ;;  %v879_v63 = vand.u32 3, %v398_v59 }
  0xa0   :  { %v2010_v13 = vadd.f32 %v1093_v49, %v2005_v33  ;;  %v376_v39 = vsel %vm374_vm13, %v375_v62, %v373_v10 }
  0xa1   :  { %v377_v11 = vclz %v376_v39  ;;  %vm884_vm8 = vcmp.eq.s32.totalorder %v879_v63, 2  ;;  %vm881_vm10 = vcmp.eq.s32.totalorder %v879_v63, 0  ;;  %vm880_vm11 = vcmp.lt.s32.totalorder %v879_v63, 2 }
  0xa2   :  { %1101 = vrot.lane.b32.xlu1 %v2010_v13, %s1541_s0 }
  0xa3   :  { %v1431_v34 = vadd.s32 4294967294, %v377_v11 }
  0xa5   :  { %vm1432_vm5 = vcmp.lt.s32.totalorder %v1431_v34, 0 }
  0xa6   :  { %v380_v26 = vsel %vm1432_vm5, 0, %v1431_v34  ;;  %v416_v34 = vand.u32 3, %v415_v14 }
  0xa7   :  { %v381_v21 = vsub.s32 32, %v380_v26  ;;  %v382_v23 = vshll.u32 %v373_v10, %v380_v26  ;;  %v385_v1 = vsub.s32 4294967266, %v380_v26  ;;  %v1189_v10 = vmul.f32 %v1473_v37, %v1942_v15 }
  0xa8   :  { %vm417_vm1 = vcmp.lt.s32.totalorder %v416_v34, 2  ;;  %vm418_vm9 = vcmp.eq.s32.totalorder %v416_v34, 0 }
  0xa9   :  { %v383_v16 = vshrl.u32 %v1966_v30, %v381_v21  ;;  %v386_v36 = vadd.s32 127, %v385_v1  ;;  %v2022_v30 = vsel %vm79_vm2, %v1048_v40, %v1051_v53  ;;  %v2047_v62 = vadd.f32 %v1189_v10, %v1186_v35 }
  0xaa   :  { %v2036_v32 = vmul.f32 %v2032_v60, %v2022_v30  ;;  %vm421_vm2 = vcmp.eq.s32.totalorder %v416_v34, 2  ;;  %v2053_v1 = vadd.f32 %v1946_v54, %v1963_v20  ;;  %v1065_v54 = vmul.f32 %v1625_v12, %v1625_v12 }
  0xab   :  { %v384_v47 = vor.u32 %v383_v16, %v382_v23  ;;  %v387_v0 = vshll.u32 %v386_v36, 23  ;;  %v1085_v20 = vmul.f32 %v1473_v37, %v1952_v61 }
  0xac   :  { %v2040_v41 = vsub.f32 %v2030_v57, %v2036_v32 }
  0xad   :  { %v388_v5 = vor.u32 4788187, %v387_v0  ;;  %v391_v46 = vcvt.s32.f32 %v384_v47  ;;  %v1056_v47 = vmul.f32 0.041666668, %v1599_v31  ;;  %v1188_v31 = vmul.f32 %v2032_v60, %v2001_v9 }
  0xae   :  { %1150 = vrot.lane.b32.xlu1 %v2040_v41, %s1541_s0 }
  0xaf   :  { %v389_v3 = vand.u32 2147483647, %v388_v5  ;;  %v1059_v7 = vsub.f32 0.5, %v1056_v47  ;;  %v1329_v47 = vmul.f32 %v1997_v56, %v2022_v30 }
  0xb1   :  { %v392_v28 = vmul.f32 %v391_v46, %v389_v3  ;;  %v1047_v3 = vsub.f32 1.0, %v1044_v22 }
  0xb3   :  { %v393_v58 = vxor.u32 2147483648, %v392_v28 }
  0xb5   :  { %v394_v25 = vsel %vm273_vm6, %v393_v58, %v392_v28 }
  0xb6   :  { %v397_v29 = vsel %vm272_vm7, %v1631_v18, %v394_v25  ;;  %1195 = vrot.lane.b32.xlu1 %v2047_v62, %s1541_s0  ;;  %v1278_v18 = vmul.f32 %v1473_v37, %v1085_v20 }
  0xb7   :  { %v399_v55 = vmul.f32 %v397_v29, %v397_v29 }
  0xb9   :  { %v400_v43 = vmul.f32 -0.001358992, %v399_v55  ;;  %v407_v24 = vmul.f32 -0.00019511016, %v399_v55 }
  0xbb   :  { %v401_v8 = vadd.f32 0.041655596, %v400_v43  ;;  %v408_v51 = vadd.f32 0.008332121, %v407_v24  ;;  %v1474_v24 = vld [vmem:[#allocation4 + $0x8] sm:$0xff] }
  0xbd   :  { %v402_v45 = vmul.f32 %v401_v8, %v399_v55  ;;  %v409_v49 = vmul.f32 %v408_v51, %v399_v55  ;;  %v1475_v8 = vld [vmem:[#allocation4 + $0x20] sm:$0xff]  ;;  %v1476_v51 = vld [vmem:[#allocation4 + $0x38] sm:$0xff] }
  0xbe   :  { %1238 = vrot.lane.b32.xlu1 %v2053_v1, %s1541_s0 }
  0xbf   :  { %v403_v39 = vadd.f32 -0.4999988, %v402_v45  ;;  %v410_v11 = vadd.f32 -0.16666654, %v409_v49  ;;  %v1324_v45 = vmul.f32 %v1472_v17, %v1085_v20  ;;  %v1477_v49 = vld [vmem:[#allocation4] sm:$0xff]  ;;  %v1087_v17 = vmul.f32 %v2026_v50, %v1995_v52  ;;  %v1342_v20 = vld [vmem:[#allocation3 + $0x88] sm:$0xff] }
  0xc1   :  { %v404_v4 = vmul.f32 %v403_v39, %v399_v55  ;;  %v411_v42 = vmul.f32 %v410_v11, %v399_v55  ;;  %v1327_v39 = vmul.f32 %v1477_v49, %v1942_v15  ;;  %v1191_v15 = vmul.f32 %v2026_v50, %v2022_v30 }
  0xc2   :  { %v1088_v30 = vlaneseq }
  0xc3   :  { %v405_v26 = vadd.f32 1.0, %v404_v4  ;;  %v412_v21 = vadd.f32 1.0, %v411_v42  ;;  %v2085_v42 = vsub.f32 %v1324_v45, %v1327_v39 }
  0xc5   :  { %v413_v48 = vmul.f32 %v412_v21, %v397_v29  ;;  %v422_v23 = vxor.u32 2147483648, %v405_v26  ;;  %v2066_v29 = vadd.f32 %v1278_v18, %v1937_v6  ;;  %v1280_v21 = vmul.f32 %v2026_v50, %v1087_v17  ;;  %v1340_v50 = vld [vmem:[#allocation3 + $0x78] sm:$0xff] }
  0xc7   :  { %v419_v16 = vxor.u32 2147483648, %v413_v48  ;;  %v423_v36 = vsel %vm421_vm2, %v422_v23, %v413_v48  ;;  %v886_v2 = vsel %vm884_vm8, %v422_v23, %v413_v48  ;;  %1284 = vrot.lane.b32.xlu1 %v2066_v29, %s1541_s0  ;;  %v2100_v48 = vadd.f32 %v1191_v15, %v1188_v31 }
  0xc8   :  { %v2103_v23 = vadd.f32 %v1280_v21, %v2005_v33  ;;  %v1326_v33 = vmul.f32 %v2032_v60, %v1087_v17 }
  0xc9   :  { %v420_v0 = vsel %vm418_vm9, %v405_v26, %v419_v16  ;;  %v883_v5 = vsel %vm881_vm10, %v405_v26, %v419_v16  ;;  %v1123_v26 = vpop.permute.xlu0 %1122  ;;  %v1341_v16 = vld [vmem:[#allocation3 + $0x80] sm:$0xff] }
  0xca   :  { %v424_v46 = vsel %vm417_vm1, %v420_v0, %v423_v36  ;;  %v887_v53 = vsel %vm880_vm11, %v883_v5, %v886_v2  ;;  %v2118_v0 = vpop.permute.xlu2 %1117  ;;  %v2120_v5 = vsub.f32 %v1326_v33, %v1329_v47 }
  0xcb   :  { %v425_v40 = vsel %vm414_vm12, nan, %v424_v46  ;;  %v888_v28 = vsel %vm414_vm12, nan, %v887_v53 }
  0xcc   :  { %v1050_v58 = vmul.f32 %v425_v40, %v1625_v12  ;;  %v1062_v25 = vsub.f32 1.0, %v888_v28  ;;  %v1080_v6 = vsel %vm78_vm3, %v1077_v44, %v888_v28  ;;  %v1162_v40 = vpop.permute.xlu1 %1161 }
  0xce   :  { %v1068_v55 = vmul.f32 %v1065_v54, %v1062_v25  ;;  %v1053_v61 = vsel %vm78_vm3, %v1047_v3, %v1050_v58  ;;  %v2124_v54 = vadd.f32 %v2036_v32, %v2030_v57  ;;  %v2138_v32 = vand.u32 127, %v1088_v30 }
  0xcf   :  { %v1190_v12 = vmul.f32 %v1475_v8, %v1053_v61  ;;  %v1141_v14 = vmul.f32 %v1476_v51, %v1053_v61  ;;  %1333 = vrot.lane.b32.xlu1 %v2085_v42, %s1541_s0  ;;  %v1328_v9 = vmul.f32 %v1474_v24, %v1053_v61 }
  0xd0   :  { %v1071_v43 = vsel %vm78_vm3, %v1059_v7, %v1068_v55  ;;  %vm1090_vm3 = vcmp.eq.s32.totalorder %v2138_v32, 0  ;;  %vm1376_vm13 = vcmp.gt.s32.totalorder %v2138_v32, 0 }
  0xd1   :  { %v1083_v59 = vmul.f32 %v1474_v24, %v1071_v43  ;;  %v1086_v22 = vmul.f32 %v1475_v8, %v1071_v43  ;;  %v2111_v2 = vpop.permute.xlu0 %1210 }
  0xd2   :  { %v2130_v60 = vpop.permute.xlu2 %1166 }
  0xd3   :  { %v1092_v35 = vmul.f32 %v1474_v24, %v1083_v59  ;;  %v1187_v37 = vmul.f32 %v1476_v51, %v1083_v59  ;;  %v1138_v10 = vmul.f32 %v1475_v8, %v1083_v59  ;;  %v1325_v52 = vmul.f32 %v1476_v51, %v1086_v22 }
  0xd4   :  { %v1279_v53 = vmul.f32 %v1475_v8, %v1086_v22  ;;  %v1216_v7 = vpop.permute.xlu1 %1215 }
  0xd5   :  { %v2077_v11 = vadd.f32 %v1092_v35, %v1080_v6  ;;  %v2079_v34 = vadd.f32 %v1190_v12, %v1187_v37  ;;  %v2081_v63 = vsub.f32 %v1138_v10, %v1141_v14  ;;  %v2083_v4 = vadd.f32 %v1141_v14, %v1138_v10 }
  0xd6   :  { %v2109_v36 = vsub.f32 %v1325_v52, %v1328_v9  ;;  %v2132_v56 = vadd.f32 %v1279_v53, %v1080_v6 }
  0xd7   :  { %1099 = vrot.lane.b32.xlu0 %v2077_v11, %s1541_s0  ;;  %1197 = vrot.lane.b32.xlu2 %v2079_v34, %s1541_s0 }
  0xd8   :  { %1353 = vperm.xlu1 %1460, %v1341_v16  }
  0xd9   :  { %v2126_v46 = vpop.permute.xlu0 %1220 }
  0xda   :  { %v1172_v57 = vpop.permute.xlu2 %1171 }
  0xdc   :  { %v1259_v55 = vpop.permute.xlu1 %1258 }
  0xdf   :  { %1148 = vrot.lane.b32.xlu0 %v2081_v63, %s1541_s0  ;;  %1199 = vrot.lane.b32.xlu2 %v2100_v48, %s1541_s0 }
  0xe1   :  { %v2136_v3 = vpop.permute.xlu0 %1253 }
  0xe4   :  { %v2154_v61 = vpop.permute.xlu1 %1304 }
  0xe7   :  { %1348 = vperm.xlu0 %1462, %v1340_v50   ;;  %1240 = vrot.lane.b32.xlu2 %v2083_v4, %s1541_s0 }
  0xe9   :  { %v1264_v18 = vpop.permute.xlu0 %1263 }
  0xea   :  { %v1147_v28 = vpop.permute.xlu2 %1146 }
  0xeb   :  { %1156 = vst.msk [vmem:[#allocation3 + $0x18] sm:$0xff] %vm32_vm0, %v1147_v28  ;;  %v1174_v58 = vsel %vm1090_vm3, %v1162_v40, %v1147_v28 }
  0xec   :  { %v1177_v43 = vsub.f32 %v1973_v19, %v1174_v58 }
  0xee   :  { %v1180_v12 = vand.u32 2147483647, %v1177_v43 }
  0xef   :  { %1358 = vperm.xlu0 %1462, %v1342_v20   ;;  %1242 = vrot.lane.b32.xlu2 %v2124_v54, %s1541_s0 }
  0xf1   :  { %v2148_v25 = vpop.permute.xlu0 %1299 }
  0xf7   :  { %1286 = vrot.lane.b32.xlu2 %v2132_v56, %s1541_s0 }
  0xf9   :  { %v2152_v44 = vpop.permute.xlu0 %1309 }
  0xff   :  { %1288 = vrot.lane.b32.xlu2 %v2103_v23, %s1541_s0 }
 0x102   :  { %v1098_v24 = vpop.permute.xlu0 %1097 }
 0x103   :  { %1107 = vst.msk [vmem:[#allocation3] sm:$0xff] %vm32_vm0, %v1098_v24  ;;  %v1125_v59 = vsel %vm1090_vm3, %v1113_v27, %v1098_v24 }
 0x104   :  { %v1128_v8 = vsub.f32 %v1969_v38, %v1125_v59 }
 0x106   :  { %v1131_v51 = vand.u32 2147483647, %v1128_v8 }
 0x107   :  { %1335 = vrot.lane.b32.xlu2 %v2109_v36, %s1541_s0 }
 0x108   :  { %v2162_v6 = vadd.f32 %v1180_v12, %v1131_v51 }
 0x10f   :  { %1337 = vrot.lane.b32.xlu2 %v2120_v5, %s1541_s0 }
 0x114   :  { %v1102_v14 = vpop.permute.xlu1 %1101 }
 0x115   :  { %1109 = vst.msk [vmem:[#allocation3 + $0x10] sm:$0xff] %vm32_vm0, %v1102_v14  ;;  %v1127_v35 = vsel %vm1090_vm3, %v1123_v26, %v1102_v14 }
 0x116   :  { %v1130_v19 = vsub.f32 %v2010_v13, %v1127_v35 }
 0x118   :  { %v1133_v45 = vand.u32 2147483647, %v1130_v19 }
 0x120   :  { %v1151_v37 = vpop.permute.xlu1 %1150 }
 0x121   :  { %1158 = vst.msk [vmem:[#allocation3 + $0x28] sm:$0xff] %vm32_vm0, %v1151_v37  ;;  %v1176_v10 = vsel %vm1090_vm3, %v1172_v57, %v1151_v37 }
 0x122   :  { %v1179_v38 = vsub.f32 %v2040_v41, %v1176_v10 }
 0x124   :  { %v1182_v49 = vand.u32 2147483647, %v1179_v38 }
 0x126   :  { %v1185_v39 = vadd.f32 %v1182_v49, %v1133_v45 }
 0x128   :  { %v1196_v15 = vpop.permute.xlu1 %1195 }
 0x129   :  { %1205 = vst.msk [vmem:[#allocation3 + $0x30] sm:$0xff] %vm32_vm0, %v1196_v15 }
 0x130   :  { %v1239_v13 = vpop.permute.xlu1 %1238 }
 0x131   :  { %v1198_v31 = vpop.permute.xlu2 %1197  ;;  %1248 = vst.msk [vmem:[#allocation3 + $0x48] sm:$0xff] %vm32_vm0, %v1239_v13 }
 0x132   :  { %1206 = vst.msk [vmem:[#allocation3 + $0x38] sm:$0xff] %vm32_vm0, %v1198_v31  ;;  %v1224_v47 = vsel %vm1090_vm3, %v1216_v7, %v1198_v31 }
 0x139   :  { %v1200_v17 = vpop.permute.xlu2 %1199  ;;  %v1285_v21 = vpop.permute.xlu1 %1284 }
 0x13a   :  { %1207 = vst.msk [vmem:[#allocation3 + $0x40] sm:$0xff] %vm32_vm0, %v1200_v17  ;;  %v1225_v52 = vsel %vm1090_vm3, %v2126_v46, %v1200_v17 }
 0x13b   :  { %1294 = vst.msk [vmem:[#allocation3 + $0x60] sm:$0xff] %vm32_vm0, %v1285_v21  ;;  %v1228_v53 = vsub.f32 %v2100_v48, %v1225_v52  ;;  %v1227_v48 = vsub.f32 %v2079_v34, %v1224_v47 }
 0x13d   :  { %v1231_v40 = vand.u32 2147483647, %v1228_v53  ;;  %v1230_v34 = vand.u32 2147483647, %v1227_v48 }
 0x13f   :  { %v1234_v7 = vadd.f32 %v1231_v40, %v1185_v39 }
 0x141   :  { %v1241_v26 = vpop.permute.xlu2 %1240  ;;  %v1334_v16 = vpop.permute.xlu1 %1333 }
 0x142   :  { %1249 = vst.msk [vmem:[#allocation3 + $0x50] sm:$0xff] %vm32_vm0, %v1241_v26  ;;  %v1267_v58 = vsel %vm1090_vm3, %v1259_v55, %v1241_v26 }
 0x143   :  { %1343 = vst.msk [vmem:[#allocation3 + $0x78] sm:$0xff] %vm32_vm0, %v1334_v16 }
 0x149   :  { %v1100_v41 = vpop.permute.xlu0 %1099  ;;  %v1243_v22 = vpop.permute.xlu2 %1242 }
 0x14a   :  { %1108 = vst.msk [vmem:[#allocation3 + $0x8] sm:$0xff] %vm32_vm0, %v1100_v41  ;;  %v1126_v9 = vsel %vm1090_vm3, %v2118_v0, %v1100_v41  ;;  %v1223_v0 = vsel %vm1090_vm3, %v2111_v2, %v1196_v15  ;;  %v1268_v30 = vsel %vm1090_vm3, %v1264_v18, %v1243_v22  ;;  %v1312_v18 = vsel %vm1090_vm3, %v2148_v25, %v1285_v21 }
 0x14b   :  { %1250 = vst.msk [vmem:[#allocation3 + $0x58] sm:$0xff] %vm32_vm0, %v1243_v22  ;;  %v1129_v27 = vsub.f32 %v2077_v11, %v1126_v9  ;;  %v1226_v11 = vsub.f32 %v2047_v62, %v1223_v0  ;;  %v1271_v28 = vsub.f32 %v2124_v54, %v1268_v30  ;;  %v1315_v8 = vsub.f32 %v2066_v29, %v1312_v18 }
 0x14d   :  { %v1229_v59 = vand.u32 2147483647, %v1226_v11  ;;  %v1274_v55 = vand.u32 2147483647, %v1271_v28  ;;  %v1318_v45 = vand.u32 2147483647, %v1315_v8 }
 0x14f   :  { %v1277_v35 = vadd.f32 %v1274_v55, %v1234_v7  ;;  %v1232_v37 = vadd.f32 %v1229_v59, %v2162_v6 }
 0x151   :  { %v1149_v50 = vpop.permute.xlu0 %1148  ;;  %v1287_v33 = vpop.permute.xlu2 %1286 }
 0x152   :  { %1157 = vst.msk [vmem:[#allocation3 + $0x20] sm:$0xff] %vm32_vm0, %v1149_v50  ;;  %v1175_v20 = vsel %vm1090_vm3, %v2130_v60, %v1149_v50  ;;  %v1266_v60 = vsel %vm1090_vm3, %v2136_v3, %v1239_v13  ;;  %v1313_v12 = vsel %vm1090_vm3, %v2154_v61, %v1287_v33 }
 0x153   :  { %v1178_v46 = vsub.f32 %v2081_v63, %v1175_v20  ;;  %1295 = vst.msk [vmem:[#allocation3 + $0x68] sm:$0xff] %vm32_vm0, %v1287_v33  ;;  %v1132_v63 = vand.u32 2147483647, %v1129_v27  ;;  %v1269_v2 = vsub.f32 %v2053_v1, %v1266_v60  ;;  %v1270_v1 = vsub.f32 %v2083_v4, %v1267_v58 }
 0x154   :  { %v1316_v4 = vsub.f32 %v2132_v56, %v1313_v12 }
 0x155   :  { %v1181_v57 = vand.u32 2147483647, %v1178_v46  ;;  %v1272_v51 = vand.u32 2147483647, %v1269_v2  ;;  %v1273_v10 = vand.u32 2147483647, %v1270_v1 }
 0x156   :  { %v1319_v15 = vand.u32 2147483647, %v1316_v4 }
 0x157   :  { %v1184_v43 = vadd.f32 %v1181_v57, %v1132_v63  ;;  %v1275_v29 = vadd.f32 %v1272_v51, %v1232_v37 }
 0x159   :  { %v1349_v3 = vpop.permute.xlu0 %1348  ;;  %v1289_v24 = vpop.permute.xlu2 %1288  ;;  %v1233_v14 = vadd.f32 %v1230_v34, %v1184_v43  ;;  %v1321_v17 = vadd.f32 %v1318_v45, %v1275_v29 }
 0x15a   :  { %1296 = vst.msk [vmem:[#allocation3 + $0x70] sm:$0xff] %vm32_vm0, %v1289_v24  ;;  %v1314_v62 = vsel %vm1090_vm3, %v2152_v44, %v1289_v24  ;;  %v1361_v54 = vsel %vm1090_vm3, %v1349_v3, %v1334_v16 }
 0x15b   :  { %v1317_v25 = vsub.f32 %v2103_v23, %v1314_v62  ;;  %v1364_v44 = vsub.f32 %v2085_v42, %v1361_v54  ;;  %v1354_v23 = vpop.permute.xlu1 %1353  ;;  %v1276_v49 = vadd.f32 %v1273_v10, %v1233_v14 }
 0x15d   :  { %v1320_v19 = vand.u32 2147483647, %v1317_v25  ;;  %v1367_v31 = vand.u32 2147483647, %v1364_v44  ;;  %v1322_v6 = vadd.f32 %v1319_v15, %v1276_v49 }
 0x15f   :  { %v1323_v38 = vadd.f32 %v1320_v19, %v1277_v35  ;;  %v1370_v13 = vadd.f32 %v1367_v31, %v1321_v17 }
 0x161   :  { %v1336_v39 = vpop.permute.xlu2 %1335  ;;  %v1359_v21 = vpop.permute.xlu0 %1358  ;;  %v1377_v22 = vsel %vm1376_vm13, %v1370_v13, 0.0 }
 0x162   :  { %1344 = vst.msk [vmem:[#allocation3 + $0x80] sm:$0xff] %vm32_vm0, %v1336_v39  ;;  %v1362_v61 = vsel %vm1090_vm3, %v1354_v23, %v1336_v39 }
 0x163   :  { %v1365_v42 = vsub.f32 %v2109_v36, %v1362_v61 }
 0x165   :  { %v1368_v26 = vand.u32 2147483647, %v1365_v42 }
 0x167   :  { %v1371_v56 = vadd.f32 %v1368_v26, %v1322_v6 }
 0x169   :  { %v1338_v41 = vpop.permute.xlu2 %1337  ;;  %v1378_v16 = vsel %vm1376_vm13, %v1371_v56, 0.0 }
 0x16a   :  { %1345 = vst.msk [vmem:[#allocation3 + $0x88] sm:$0xff] %vm32_vm0, %v1338_v41  ;;  %v1363_v52 = vsel %vm1090_vm3, %v1359_v21, %v1338_v41  ;;  %v1395_v9 = vadd.f32 %v1378_v16, %v1377_v22  ;;  %vm1408_vm0 = vcmask 0  }
 0x16b   :  { %v1366_v50 = vsub.f32 %v2120_v5, %v1363_v52 }
 0x16d   :  { %v1369_v33 = vand.u32 2147483647, %v1366_v50 }
 0x16f   :  { %v1372_v36 = vadd.f32 %v1369_v33, %v1323_v38 }
 0x171   :  { %v1379_v47 = vsel %vm1376_vm13, %v1372_v36, 0.0 }
 0x172   :  { %v1396_v20 = vadd.f32 %v1395_v9, %v1379_v47 }
 0x174   :  { %1397 = vadd.xlane.f32.xlu1 %v1396_v20 }
 0x1e7   :  { %v1398_v53 = vpop.xlane.xlu1 %1397 }
 0x1e8   :  { %v1399_v27 = vrot.slane %v1398_v53, 4 }
 0x1ea   :  { %v1400_v46 = vadd.f32 %v1399_v27, %v1398_v53 }
 0x1ec   :  { %v1401_v0 = vrot.slane %v1400_v46, 2 }
 0x1ee   :  { %v1402_v30 = vadd.f32 %v1401_v0, %v1400_v46 }
 0x1f0   :  { %v1403_v57 = vrot.slane %v1402_v30, 1 }
 0x1f2   :  { %v1404_v60 = vadd.f32 %v1403_v57, %v1402_v30 }
 0x1f4   :  { %1445 = vpush %v1404_v60 }
 0x225   :  { %s1446_s18 = spop %1445 }
 0x226   :  { %v1406_v5 = vstv %s1446_s18 }
 0x227   :  { %v1407_v32 = vmul.f32 0.125, %v1406_v5 }
 0x229   :  { %1409 = vst.msk [vmem:[#allocation7] sm:$0x1] %vm1408_vm0, %v1407_v32 }
 0x22a   :  { %1420 = dma.vmem_to_hbm [thread:$0]  %s1416_s14, 16, %s1418_s17, [#allocation6]  }
 0x22b   :  { %1528 = dma.done.wait [#allocation6], 16  }
 0x22c   :  { %1529 = vsyncadd [#allocation6], 4294967280 }
 0x22d   :  { %1425 = vsyncpa [#allocation5], 1 }
 0x22e   :  { %1426 = vsyncpa [#allocation6], 1 }

</bundles_post_ra>
